<compile_context>
chip_gen: v7x
topology: tpu7x:2x2x1
jax: 0.10.0
libtpu: 0.0.40
codegen_flags: <defaults>
</compile_context>

<pallas_src>
import jax
import jax.numpy as jnp
from jax.experimental import pallas as pl
from jax.experimental.pallas import tpu as pltpu

# Sizes implied by the module (inputLayer / outputLayer are data-dependent in
# the original script; small deterministic stand-ins for a tabular MLP).
IN_DIM = 32
H1, H2, H3, H4, H5 = 128, 256, 128, 256, 128
OUT_DIM = 8

OUT_PAD = 128      # lane-dense padded output dim (unmasked stores)
BATCH_TILE = 256   # rows per grid step (amortises per-step pipeline overhead)
BATCH = 1024       # demo batch -> grid=(4,): v7x's 2 TCs each get 2 steps


def mlp_kernel(x_ref,
               w0, b0, w1, b1, w2, b2, w3, b3, w4, b4, w5, b5,
               o_ref):
    """Whole MLP per batch tile: bf16 matmuls on the MXU, f32 accumulate."""

    def layer(h_bf16, w_ref, b_ref, relu):
        acc = jnp.dot(h_bf16, w_ref[...], preferred_element_type=jnp.float32)
        acc = acc + b_ref[...]            # bias-add in f32 (VPU)
        if relu:
            acc = jnp.maximum(acc, 0.0)
        return acc

    # x arrives f32 and un-padded (K = 32); cast to bf16 in-register instead
    # of materializing a padded / pre-cast copy of x in HBM.
    h = layer(x_ref[...].astype(jnp.bfloat16), w0, b0, relu=True)   # relu(input)
    h = layer(h.astype(jnp.bfloat16), w1, b1, relu=True)            # relu(hidden1)
    h = layer(h.astype(jnp.bfloat16), w2, b2, relu=True)            # relu(hidden2)
    # TODO(synk): nn.Dropout(0.2) is identity in eval mode; training-time
    # stochastic masking (pltpu.prng_random_bits) intentionally omitted.
    h = layer(h.astype(jnp.bfloat16), w3, b3, relu=True)            # relu(hidden3)
    h = layer(h.astype(jnp.bfloat16), w4, b4, relu=True)            # relu(hidden4)
    # dropout -> identity (eval)
    o_ref[...] = layer(h.astype(jnp.bfloat16), w5, b5, relu=False)  # output


def prepare_params(params):
    """ONE-TIME (init-time) cast/pad: bf16 weights, f32 biases; last layer's N
    zero-padded OUT_DIM -> OUT_PAD so the output store is lane-dense.
    Keep the result and reuse it on every forward call."""
    flat = []
    n_layers = len(params)
    for i, (w, b) in enumerate(params):
        w_bf = w.astype(jnp.bfloat16)
        b_f = b.astype(jnp.float32).reshape(1, -1)
        if i == n_layers - 1:
            w_bf = (jnp.zeros((w.shape[0], OUT_PAD), jnp.bfloat16)
                    .at[:, :w.shape[1]].set(w_bf))
            b_f = (jnp.zeros((1, OUT_PAD), jnp.float32)
                   .at[:, :b_f.shape[1]].set(b_f))
        flat.extend([w_bf, b_f])
    return tuple(flat)


def mlp_forward(x, flat_params):
    """x: (batch, IN_DIM) f32.  flat_params: output of prepare_params()."""
    batch = x.shape[0]
    padded_batch = ((batch + BATCH_TILE - 1) // BATCH_TILE) * BATCH_TILE
    if padded_batch != batch:   # ragged batch: pad rows, slice afterwards
        x = jnp.zeros((padded_batch, x.shape[1]), x.dtype).at[:batch].set(x)

    # Batch-blocked x / out; weights & biases use a constant block index so
    # they are DMA'd once and stay VMEM-resident across grid steps.
    # (pipeline_mode=pl.Buffered(1) would also drop their second buffer, but
    #  at ~300 KB total the saving is negligible at these layer widths.)
    weight_specs = [pl.BlockSpec(a.shape, lambda i: (0, 0)) for a in flat_params]
    in_specs = ([pl.BlockSpec((BATCH_TILE, IN_DIM), lambda i: (i, 0))]
                + weight_specs)
    out_specs = pl.BlockSpec((BATCH_TILE, OUT_PAD), lambda i: (i, 0))

    out_pad = pl.pallas_call(
        mlp_kernel,
        out_shape=jax.ShapeDtypeStruct((padded_batch, OUT_PAD), jnp.float32),
        grid=(padded_batch // BATCH_TILE,),
        in_specs=in_specs,
        out_specs=out_specs,
        compiler_params=pltpu.CompilerParams(
            # Batch blocks are independent -> shard across v7x's 2 TCs.
            # (If profiling ever shows only one busy TC, switch this axis to
            #  pltpu.CORE_PARALLEL.)
            dimension_semantics=("parallel",)),
    )(x, *flat_params)

    return out_pad[:batch, :OUT_DIM]


def init_params(key):
    dims = [IN_DIM, H1, H2, H3, H4, H5, OUT_DIM]
    params = []
    for i in range(len(dims) - 1):
        fan_in, fan_out = dims[i], dims[i + 1]
        key, kw, kb = jax.random.split(key, 3)
        bound = 1.0 / jnp.sqrt(fan_in)
        w = jax.random.uniform(kw, (fan_in, fan_out), jnp.float32, -bound, bound)
        b = jax.random.uniform(kb, (1, fan_out), jnp.float32, -bound, bound)
        params.append((w, b))
    return params


def mlp_reference(x, params):
    """Same numerics as the kernel: bf16 weights/activations, f32 accumulate."""
    h = x.astype(jnp.bfloat16)
    out = None
    for i, (w, b) in enumerate(params):
        acc = jnp.dot(h, w.astype(jnp.bfloat16),
                      preferred_element_type=jnp.float32) + b.astype(jnp.float32)
        if i < len(params) - 1:
            h = jnp.maximum(acc, 0.0).astype(jnp.bfloat16)
        else:
            out = acc
    return out


if __name__ == "__main__":
    key = jax.random.PRNGKey(0)
    key, kx = jax.random.split(key)
    x = jax.random.uniform(kx, (BATCH, IN_DIM), jnp.float32)
    params = init_params(key)

    flat_params = prepare_params(params)          # one-time cast/pad (hoisted)
    fwd = jax.jit(mlp_forward)

    out = jax.block_until_ready(fwd(x, flat_params))

    ref = mlp_reference(x, params)
    assert out.shape == (BATCH, OUT_DIM)
    assert jnp.allclose(out, ref, atol=2e-2, rtol=2e-2), (
        float(jnp.max(jnp.abs(out - ref))))
    print("KERNEL_OK")
</pallas_src>

<mosaic_0001>
module attributes {stable_mosaic.version = 11 : i64} {
  func.func @mlp_kernel(%arg0: i32, %arg1: memref<256x32xf32, #tpu.memory_space<vmem>>, %arg2: memref<32x128xbf16, #tpu.memory_space<vmem>>, %arg3: memref<1x128xf32, #tpu.memory_space<vmem>>, %arg4: memref<128x256xbf16, #tpu.memory_space<vmem>>, %arg5: memref<1x256xf32, #tpu.memory_space<vmem>>, %arg6: memref<256x128xbf16, #tpu.memory_space<vmem>>, %arg7: memref<1x128xf32, #tpu.memory_space<vmem>>, %arg8: memref<128x256xbf16, #tpu.memory_space<vmem>>, %arg9: memref<1x256xf32, #tpu.memory_space<vmem>>, %arg10: memref<256x128xbf16, #tpu.memory_space<vmem>>, %arg11: memref<1x128xf32, #tpu.memory_space<vmem>>, %arg12: memref<128x128xbf16, #tpu.memory_space<vmem>>, %arg13: memref<1x128xf32, #tpu.memory_space<vmem>>, %arg14: memref<256x128xf32, #tpu.memory_space<vmem>>) attributes {dimension_semantics = [#tpu.dimension_semantics<parallel>], iteration_bounds = array<i64: 4>, scalar_prefetch = 0 : i64, scratch_operands = 0 : i64, tpu.core_type = #tpu.core_type<tc>, window_params = [{transform_indices = @transform_0, window_bounds = array<i64: 256, 32>}, {pipeline_mode = #tpu.pipeline_mode<synchronous>, transform_indices = @transform_1, window_bounds = array<i64: 32, 128>}, {pipeline_mode = #tpu.pipeline_mode<synchronous>, transform_indices = @transform_2, window_bounds = array<i64: 1, 128>}, {pipeline_mode = #tpu.pipeline_mode<synchronous>, transform_indices = @transform_3, window_bounds = array<i64: 128, 256>}, {pipeline_mode = #tpu.pipeline_mode<synchronous>, transform_indices = @transform_4, window_bounds = array<i64: 1, 256>}, {pipeline_mode = #tpu.pipeline_mode<synchronous>, transform_indices = @transform_5, window_bounds = array<i64: 256, 128>}, {pipeline_mode = #tpu.pipeline_mode<synchronous>, transform_indices = @transform_6, window_bounds = array<i64: 1, 128>}, {pipeline_mode = #tpu.pipeline_mode<synchronous>, transform_indices = @transform_7, window_bounds = array<i64: 128, 256>}, {pipeline_mode = #tpu.pipeline_mode<synchronous>, transform_indices = @transform_8, window_bounds = array<i64: 1, 256>}, {pipeline_mode = #tpu.pipeline_mode<synchronous>, transform_indices = @transform_9, window_bounds = array<i64: 256, 128>}, {pipeline_mode = #tpu.pipeline_mode<synchronous>, transform_indices = @transform_10, window_bounds = array<i64: 1, 128>}, {pipeline_mode = #tpu.pipeline_mode<synchronous>, transform_indices = @transform_11, window_bounds = array<i64: 128, 128>}, {pipeline_mode = #tpu.pipeline_mode<synchronous>, transform_indices = @transform_12, window_bounds = array<i64: 1, 128>}, {transform_indices = @transform_13, window_bounds = array<i64: 256, 128>}]} {
    %c0 = arith.constant 0 : index
    %c0_0 = arith.constant 0 : index
    %0 = vector.load %arg1[%c0, %c0_0] : memref<256x32xf32, #tpu.memory_space<vmem>>, vector<256x32xf32>
    %1 = arith.truncf %0 : vector<256x32xf32> to vector<256x32xbf16>
    %c0_1 = arith.constant 0 : index
    %c0_2 = arith.constant 0 : index
    %2 = vector.load %arg2[%c0_1, %c0_2] : memref<32x128xbf16, #tpu.memory_space<vmem>>, vector<32x128xbf16>
    %cst = arith.constant dense<0.000000e+00> : vector<256x128xf32>
    %3 = tpu.matmul %1, %2, %cst {dimension_numbers = #tpu.dot_dimension_numbers<[1], [0], [0], [1], [0, 0, 1, 1], [], []>} : vector<256x32xbf16>, vector<32x128xbf16>, vector<256x128xf32> -> vector<256x128xf32>
    %c0_3 = arith.constant 0 : index
    %c0_4 = arith.constant 0 : index
    %4 = vector.load %arg3[%c0_3, %c0_4] : memref<1x128xf32, #tpu.memory_space<vmem>>, vector<1x128xf32>
    %5 = vector.broadcast %4 : vector<1x128xf32> to vector<256x128xf32>
    %6 = arith.addf %3, %5 : vector<256x128xf32>
    %cst_5 = arith.constant 0.000000e+00 : f32
    %7 = vector.broadcast %cst_5 : f32 to vector<256x128xf32>
    %8 = arith.maximumf %6, %7 : vector<256x128xf32>
    %9 = arith.truncf %8 : vector<256x128xf32> to vector<256x128xbf16>
    %c0_6 = arith.constant 0 : index
    %c0_7 = arith.constant 0 : index
    %10 = vector.load %arg4[%c0_6, %c0_7] : memref<128x256xbf16, #tpu.memory_space<vmem>>, vector<128x256xbf16>
    %cst_8 = arith.constant dense<0.000000e+00> : vector<256x256xf32>
    %11 = tpu.matmul %9, %10, %cst_8 {dimension_numbers = #tpu.dot_dimension_numbers<[1], [0], [0], [1], [0, 0, 1, 1], [], []>} : vector<256x128xbf16>, vector<128x256xbf16>, vector<256x256xf32> -> vector<256x256xf32>
    %c0_9 = arith.constant 0 : index
    %c0_10 = arith.constant 0 : index
    %12 = vector.load %arg5[%c0_9, %c0_10] : memref<1x256xf32, #tpu.memory_space<vmem>>, vector<1x256xf32>
    %13 = vector.broadcast %12 : vector<1x256xf32> to vector<256x256xf32>
    %14 = arith.addf %11, %13 : vector<256x256xf32>
    %cst_11 = arith.constant 0.000000e+00 : f32
    %15 = vector.broadcast %cst_11 : f32 to vector<256x256xf32>
    %16 = arith.maximumf %14, %15 : vector<256x256xf32>
    %17 = arith.truncf %16 : vector<256x256xf32> to vector<256x256xbf16>
    %c0_12 = arith.constant 0 : index
    %c0_13 = arith.constant 0 : index
    %18 = vector.load %arg6[%c0_12, %c0_13] : memref<256x128xbf16, #tpu.memory_space<vmem>>, vector<256x128xbf16>
    %cst_14 = arith.constant dense<0.000000e+00> : vector<256x128xf32>
    %19 = tpu.matmul %17, %18, %cst_14 {dimension_numbers = #tpu.dot_dimension_numbers<[1], [0], [0], [1], [0, 0, 1, 1], [], []>} : vector<256x256xbf16>, vector<256x128xbf16>, vector<256x128xf32> -> vector<256x128xf32>
    %c0_15 = arith.constant 0 : index
    %c0_16 = arith.constant 0 : index
    %20 = vector.load %arg7[%c0_15, %c0_16] : memref<1x128xf32, #tpu.memory_space<vmem>>, vector<1x128xf32>
    %21 = vector.broadcast %20 : vector<1x128xf32> to vector<256x128xf32>
    %22 = arith.addf %19, %21 : vector<256x128xf32>
    %cst_17 = arith.constant 0.000000e+00 : f32
    %23 = vector.broadcast %cst_17 : f32 to vector<256x128xf32>
    %24 = arith.maximumf %22, %23 : vector<256x128xf32>
    %25 = arith.truncf %24 : vector<256x128xf32> to vector<256x128xbf16>
    %c0_18 = arith.constant 0 : index
    %c0_19 = arith.constant 0 : index
    %26 = vector.load %arg8[%c0_18, %c0_19] : memref<128x256xbf16, #tpu.memory_space<vmem>>, vector<128x256xbf16>
    %cst_20 = arith.constant dense<0.000000e+00> : vector<256x256xf32>
    %27 = tpu.matmul %25, %26, %cst_20 {dimension_numbers = #tpu.dot_dimension_numbers<[1], [0], [0], [1], [0, 0, 1, 1], [], []>} : vector<256x128xbf16>, vector<128x256xbf16>, vector<256x256xf32> -> vector<256x256xf32>
    %c0_21 = arith.constant 0 : index
    %c0_22 = arith.constant 0 : index
    %28 = vector.load %arg9[%c0_21, %c0_22] : memref<1x256xf32, #tpu.memory_space<vmem>>, vector<1x256xf32>
    %29 = vector.broadcast %28 : vector<1x256xf32> to vector<256x256xf32>
    %30 = arith.addf %27, %29 : vector<256x256xf32>
    %cst_23 = arith.constant 0.000000e+00 : f32
    %31 = vector.broadcast %cst_23 : f32 to vector<256x256xf32>
    %32 = arith.maximumf %30, %31 : vector<256x256xf32>
    %33 = arith.truncf %32 : vector<256x256xf32> to vector<256x256xbf16>
    %c0_24 = arith.constant 0 : index
    %c0_25 = arith.constant 0 : index
    %34 = vector.load %arg10[%c0_24, %c0_25] : memref<256x128xbf16, #tpu.memory_space<vmem>>, vector<256x128xbf16>
    %cst_26 = arith.constant dense<0.000000e+00> : vector<256x128xf32>
    %35 = tpu.matmul %33, %34, %cst_26 {dimension_numbers = #tpu.dot_dimension_numbers<[1], [0], [0], [1], [0, 0, 1, 1], [], []>} : vector<256x256xbf16>, vector<256x128xbf16>, vector<256x128xf32> -> vector<256x128xf32>
    %c0_27 = arith.constant 0 : index
    %c0_28 = arith.constant 0 : index
    %36 = vector.load %arg11[%c0_27, %c0_28] : memref<1x128xf32, #tpu.memory_space<vmem>>, vector<1x128xf32>
    %37 = vector.broadcast %36 : vector<1x128xf32> to vector<256x128xf32>
    %38 = arith.addf %35, %37 : vector<256x128xf32>
    %cst_29 = arith.constant 0.000000e+00 : f32
    %39 = vector.broadcast %cst_29 : f32 to vector<256x128xf32>
    %40 = arith.maximumf %38, %39 : vector<256x128xf32>
    %41 = arith.truncf %40 : vector<256x128xf32> to vector<256x128xbf16>
    %c0_30 = arith.constant 0 : index
    %c0_31 = arith.constant 0 : index
    %42 = vector.load %arg12[%c0_30, %c0_31] : memref<128x128xbf16, #tpu.memory_space<vmem>>, vector<128x128xbf16>
    %cst_32 = arith.constant dense<0.000000e+00> : vector<256x128xf32>
    %43 = tpu.matmul %41, %42, %cst_32 {dimension_numbers = #tpu.dot_dimension_numbers<[1], [0], [0], [1], [0, 0, 1, 1], [], []>} : vector<256x128xbf16>, vector<128x128xbf16>, vector<256x128xf32> -> vector<256x128xf32>
    %c0_33 = arith.constant 0 : index
    %c0_34 = arith.constant 0 : index
    %44 = vector.load %arg13[%c0_33, %c0_34] : memref<1x128xf32, #tpu.memory_space<vmem>>, vector<1x128xf32>
    %45 = vector.broadcast %44 : vector<1x128xf32> to vector<256x128xf32>
    %46 = arith.addf %43, %45 : vector<256x128xf32>
    %c0_35 = arith.constant 0 : index
    %c0_36 = arith.constant 0 : index
    %47 = vector.load %arg14[%c0_35, %c0_36] : memref<256x128xf32, #tpu.memory_space<vmem>>, vector<256x128xf32>
    tpu.vector_store %arg14[%c0_35, %c0_36], %46 {strides = array<i32>} : memref<256x128xf32, #tpu.memory_space<vmem>>, vector<256x128xf32>,
    return
  }
  func.func @transform_0(%arg0: i32) -> (i32, i32) {
    %c0_i32 = arith.constant 0 : i32
    %c0_i32_0 = arith.constant 0 : i32
    return %arg0, %c0_i32 : i32, i32
  }
  func.func @transform_1(%arg0: i32) -> (i32, i32) {
    %c0_i32 = arith.constant 0 : i32
    %c0_i32_0 = arith.constant 0 : i32
    %c0_i32_1 = arith.constant 0 : i32
    return %c0_i32, %c0_i32_0 : i32, i32
  }
  func.func @transform_2(%arg0: i32) -> (i32, i32) {
    %c0_i32 = arith.constant 0 : i32
    %c0_i32_0 = arith.constant 0 : i32
    %c0_i32_1 = arith.constant 0 : i32
    return %c0_i32, %c0_i32_0 : i32, i32
  }
  func.func @transform_3(%arg0: i32) -> (i32, i32) {
    %c0_i32 = arith.constant 0 : i32
    %c0_i32_0 = arith.constant 0 : i32
    %c0_i32_1 = arith.constant 0 : i32
    return %c0_i32, %c0_i32_0 : i32, i32
  }
  func.func @transform_4(%arg0: i32) -> (i32, i32) {
    %c0_i32 = arith.constant 0 : i32
    %c0_i32_0 = arith.constant 0 : i32
    %c0_i32_1 = arith.constant 0 : i32
    return %c0_i32, %c0_i32_0 : i32, i32
  }
  func.func @transform_5(%arg0: i32) -> (i32, i32) {
    %c0_i32 = arith.constant 0 : i32
    %c0_i32_0 = arith.constant 0 : i32
    %c0_i32_1 = arith.constant 0 : i32
    return %c0_i32, %c0_i32_0 : i32, i32
  }
  func.func @transform_6(%arg0: i32) -> (i32, i32) {
    %c0_i32 = arith.constant 0 : i32
    %c0_i32_0 = arith.constant 0 : i32
    %c0_i32_1 = arith.constant 0 : i32
    return %c0_i32, %c0_i32_0 : i32, i32
  }
  func.func @transform_7(%arg0: i32) -> (i32, i32) {
    %c0_i32 = arith.constant 0 : i32
    %c0_i32_0 = arith.constant 0 : i32
    %c0_i32_1 = arith.constant 0 : i32
    return %c0_i32, %c0_i32_0 : i32, i32
  }
  func.func @transform_8(%arg0: i32) -> (i32, i32) {
    %c0_i32 = arith.constant 0 : i32
    %c0_i32_0 = arith.constant 0 : i32
    %c0_i32_1 = arith.constant 0 : i32
    return %c0_i32, %c0_i32_0 : i32, i32
  }
  func.func @transform_9(%arg0: i32) -> (i32, i32) {
    %c0_i32 = arith.constant 0 : i32
    %c0_i32_0 = arith.constant 0 : i32
    %c0_i32_1 = arith.constant 0 : i32
    return %c0_i32, %c0_i32_0 : i32, i32
  }
  func.func @transform_10(%arg0: i32) -> (i32, i32) {
    %c0_i32 = arith.constant 0 : i32
    %c0_i32_0 = arith.constant 0 : i32
    %c0_i32_1 = arith.constant 0 : i32
    return %c0_i32, %c0_i32_0 : i32, i32
  }
  func.func @transform_11(%arg0: i32) -> (i32, i32) {
    %c0_i32 = arith.constant 0 : i32
    %c0_i32_0 = arith.constant 0 : i32
    %c0_i32_1 = arith.constant 0 : i32
    return %c0_i32, %c0_i32_0 : i32, i32
  }
  func.func @transform_12(%arg0: i32) -> (i32, i32) {
    %c0_i32 = arith.constant 0 : i32
    %c0_i32_0 = arith.constant 0 : i32
    %c0_i32_1 = arith.constant 0 : i32
    return %c0_i32, %c0_i32_0 : i32, i32
  }
  func.func @transform_13(%arg0: i32) -> (i32, i32) {
    %c0_i32 = arith.constant 0 : i32
    %c0_i32_0 = arith.constant 0 : i32
    return %arg0, %c0_i32 : i32, i32
  }
}

</mosaic_0001>

<bundles_post_ra>
// kernel: mlp_forward.1
= control target key start
LH: loop header
LB: loop body
LE: loop exit
PB: predicated region body
PF: predicated region fallthrough
CT: control target
= control target key end

     0   :  { %s3225_s25 = smov 0   ;;  %s3892_s0 = inlined_call_operand.vmem [shape: f32[1024,32], index: 0, kind: input, shape index: {}]   ;;  %s3893_s1 = inlined_call_operand.vmem [shape: bf16[32,128], index: 1, kind: input, shape index: {}]   ;;  %s3894_s2 = inlined_call_operand.vmem [shape: f32[1,128], index: 2, kind: input, shape index: {}]   ;;  %s3895_s3 = inlined_call_operand.vmem [shape: bf16[128,256], index: 3, kind: input, shape index: {}]   ;;  %s3896_s4 = inlined_call_operand.vmem [shape: f32[1,256], index: 4, kind: input, shape index: {}]   ;;  %s3897_s5 = inlined_call_operand.vmem [shape: bf16[256,128], index: 5, kind: input, shape index: {}]   ;;  %s3898_s6 = inlined_call_operand.vmem [shape: f32[1,128], index: 6, kind: input, shape index: {}]   ;;  %s3899_s7 = inlined_call_operand.vmem [shape: bf16[128,256], index: 7, kind: input, shape index: {}]   ;;  %s3900_s8 = inlined_call_operand.vmem [shape: f32[1,256], index: 8, kind: input, shape index: {}]   ;;  %s3901_s9 = inlined_call_operand.vmem [shape: bf16[256,128], index: 9, kind: input, shape index: {}]   ;;  %s3902_s10 = inlined_call_operand.vmem [shape: f32[1,128], index: 10, kind: input, shape index: {}]   ;;  %s3903_s11 = inlined_call_operand.vmem [shape: bf16[128,128], index: 11, kind: input, shape index: {}]   ;;  %s3904_s12 = inlined_call_operand.vmem [shape: f32[1,128], index: 12, kind: input, shape index: {}]   ;;  %s3905_s13 = inlined_call_operand.vmem [shape: f32[1024,128], index: 13, kind: output, shape index: {}]  }
   0x1 LB: > { %s2576_s26 = sadd.s32 4294967295, %s3152_s25   ;;  %p2580_p0 = scmp.ge.s32.totalorder %s3152_s25, 1  ;;  %s3152_s25 = sphi %s3225_s25, %s23_s25  }
   0x2   : > { %p388_p1 = scmp.lt.s32.totalorder %s3152_s25, 5 }
   0x4   : > { %p389_p2 = pnand %p2580_p0, %p388_p1 }
   0x5   : > { %v3056_v0 = vld [vmem:[%s3893_s1] sm:$0xff] (!%p389_p2)   ;;  %s2581_s29 = sshll.u32 (!%p389_p2), %s2576_s26, 5  ;;  %v3057_v1 = vld [vmem:[%s3893_s1 + $0x8] sm:$0xff] (!%p389_p2)   ;;  %v3061_v4 = vld [vmem:[%s3895_s3 + $0x14] ss:$8 sps:$4 sm:$0xff] (!%p389_p2)   ;;  %vm516_vm0 = vcmask (!%p389_p2), 261120  }
   0x6   : > { %392 = sbr.rel (%p389_p2) target bundleno = 1469 (0x5bd), region = 72  ;;  %p433_p3 = scmp.lt.s32.totalorder (!%p389_p2), %s2581_s29, 127  ;;  %2947 = vmatprep.subr.bf16.mxu0 (!%p389_p2), %v3056_v0  ;;  %v3058_v2 = vld [vmem:[%s3895_s3 + $0x4] ss:$8 sps:$4 sm:$0xff] (!%p389_p2)   ;;  %v3060_v3 = vld [vmem:[%s3895_s3] ss:$8 sps:$4 sm:$0xff] (!%p389_p2)  }
   0x7   : > { %2948 = vmatpush3.bf16.msra.mxu0 (!%p389_p2), %v3056_v0  ;;  %882 = vmatprep.subr.bf16.mxu1 (!%p389_p2), %v3058_v2  ;;  %v3063_v5 = vld [vmem:[%s3895_s3 + $0x10] ss:$8 sps:$4 sm:$0xff] (!%p389_p2)   ;;  %v3064_v6 = vld [vmem:[%s3895_s3 + $0x24] ss:$8 sps:$4 sm:$0xff] (!%p389_p2)   ;;  %v3066_v16 = vld [vmem:[%s3895_s3 + $0x20] ss:$8 sps:$4 sm:$0xff] (!%p389_p2)  }
   0x8   : > { %2949 = vmatprep.subr.bf16.mxu0 (!%p389_p2), %v3057_v1  ;;  %883 = vmatpush1.bf16.msra.mxu1 (!%p389_p2), %v3060_v3  ;;  %v3067_v17 = vld [vmem:[%s3895_s3 + $0x34] ss:$8 sps:$4 sm:$0xff] (!%p389_p2)   ;;  %v3069_v24 = vld [vmem:[%s3895_s3 + $0x30] ss:$8 sps:$4 sm:$0xff] (!%p389_p2)   ;;  %v3070_v27 = vld [vmem:[%s3895_s3 + $0x44] ss:$8 sps:$4 sm:$0xff] (!%p389_p2)  }
   0x9   : > { %884 = vmatprep.subr.bf16.mxu1 (!%p389_p2), %v3061_v4  ;;  %v3072_v29 = vld [vmem:[%s3895_s3 + $0x40] ss:$8 sps:$4 sm:$0xff] (!%p389_p2)   ;;  %v3073_v31 = vld [vmem:[%s3895_s3 + $0x54] ss:$8 sps:$4 sm:$0xff] (!%p389_p2)   ;;  %v3075_v32 = vld [vmem:[%s3895_s3 + $0x50] ss:$8 sps:$4 sm:$0xff] (!%p389_p2)  }
   0xa   : > { %v3076_v62 = vld [vmem:[%s3895_s3 + $0x64] ss:$8 sps:$4 sm:$0xff] (!%p389_p2)   ;;  %v3078_v63 = vld [vmem:[%s3895_s3 + $0x60] ss:$8 sps:$4 sm:$0xff] (!%p389_p2)   ;;  %v3079_v0 = vld [vmem:[%s3895_s3 + $0x74] ss:$8 sps:$4 sm:$0xff] (!%p389_p2)  }
   0xb   : > { %2950 = vmatpush3.bf16.msra.mxu0 (!%p389_p2), %v3057_v1  ;;  %v3081_v1 = vld [vmem:[%s3895_s3 + $0x70] ss:$8 sps:$4 sm:$0xff] (!%p389_p2)   ;;  %v3154_v2 = vmov (!%p389_p2), 0   ;;  %v3349_v3 = vld [vmem:[%s3894_s2] ss:$0 sm:$0xff] (!%p389_p2) }
   0xc   : > { %885 = vmatpush1.bf16.msra.mxu1 (!%p389_p2), %v3063_v5  ;;  %914 = vmatprep.mubr.bf16.mxu1 (!%p389_p2), %v3154_v2 }
   0xd   : > { %s3907_s29 = smov (!%p433_p3, %s2581_s29), 127  ;;  %886 = vmatprep.subr.bf16.mxu1 %v3064_v6 }
   0xe   : > { %s2582_s21 = sshll.u32 %s3907_s29, 3 }
   0xf   : > { %s3259_s27 = scalar_lea.vmem %s3892_s0, %s2582_s21 }
  0x10   : > { %v445_v7 = vld [vmem:[%s3259_s27] sm:$0xff]  ;;  %v446_v8 = vld [vmem:[%s3259_s27 + $0x8] sm:$0xff]  ;;  %v447_v9 = vld [vmem:[%s3259_s27 + $0x10] sm:$0xff]  ;;  %887 = vmatpush1.bf16.msra.mxu1 %v3066_v16 }
  0x11   : > { %v477_v10 = vpack.c.bf16 %v446_v8, %v445_v7  ;;  %v448_v11 = vld [vmem:[%s3259_s27 + $0x18] sm:$0xff]  ;;  %v449_v12 = vld [vmem:[%s3259_s27 + $0x20] sm:$0xff]  ;;  %v450_v13 = vld [vmem:[%s3259_s27 + $0x28] sm:$0xff]  ;;  %888 = vmatprep.subr.bf16.mxu1 %v3067_v17 }
  0x12   : > { %v478_v14 = vpack.c.bf16 %v448_v11, %v447_v9  ;;  %v479_v15 = vpack.c.bf16 %v450_v13, %v449_v12  ;;  %v451_v18 = vld [vmem:[%s3259_s27 + $0x30] sm:$0xff]  ;;  %v452_v19 = vld [vmem:[%s3259_s27 + $0x38] sm:$0xff]  ;;  %v453_v20 = vld [vmem:[%s3259_s27 + $0x40] sm:$0xff] }
  0x13   : > { %2951 = vmatprep.mubr.msk.bf16.mxu0 %vm516_vm0, %v477_v10  ;;  %v454_v21 = vld [vmem:[%s3259_s27 + $0x48] sm:$0xff]  ;;  %v480_v22 = vpack.c.bf16 %v452_v19, %v451_v18  ;;  %v455_v25 = vld [vmem:[%s3259_s27 + $0x50] sm:$0xff]  ;;  %v456_v26 = vld [vmem:[%s3259_s27 + $0x58] sm:$0xff] }
  0x14   : > { %2952 = vmatmul.mubr.msk.bf16.vlgmr.msra.gmra.mrb[0].mxu0 %vm516_vm0, %v478_v14  ;;  %v481_v23 = vpack.c.bf16 %v454_v21, %v453_v20  ;;  %v457_v28 = vld [vmem:[%s3259_s27 + $0x60] sm:$0xff]  ;;  %889 = vmatpush1.bf16.msra.mxu1 %v3069_v24  ;;  %v458_v30 = vld [vmem:[%s3259_s27 + $0x68] sm:$0xff]  ;;  %v482_v33 = vpack.c.bf16 %v456_v26, %v455_v25  ;;  %v459_v35 = vld [vmem:[%s3259_s27 + $0x70] sm:$0xff] }
  0x15   : > { %2955 = vmatprep.mubr.msk.bf16.mxu0 %vm516_vm0, %v479_v15  ;;  %890 = vmatprep.subr.bf16.mxu1 %v3070_v27  ;;  %v483_v34 = vpack.c.bf16 %v458_v30, %v457_v28  ;;  %v460_v36 = vld [vmem:[%s3259_s27 + $0x78] sm:$0xff]  ;;  %v461_v37 = vld [vmem:[%s3259_s27 + $0x80] sm:$0xff]  ;;  %v462_v38 = vld [vmem:[%s3259_s27 + $0x88] sm:$0xff] }
  0x16   : > { %v484_v39 = vpack.c.bf16 %v460_v36, %v459_v35  ;;  %v485_v40 = vpack.c.bf16 %v462_v38, %v461_v37  ;;  %v463_v41 = vld [vmem:[%s3259_s27 + $0x90] sm:$0xff]  ;;  %v464_v42 = vld [vmem:[%s3259_s27 + $0x98] sm:$0xff]  ;;  %v465_v43 = vld [vmem:[%s3259_s27 + $0xa0] sm:$0xff] }
  0x17   : > { %v466_v44 = vld [vmem:[%s3259_s27 + $0xa8] sm:$0xff]  ;;  %v486_v45 = vpack.c.bf16 %v464_v42, %v463_v41  ;;  %v467_v47 = vld [vmem:[%s3259_s27 + $0xb0] sm:$0xff]  ;;  %v468_v48 = vld [vmem:[%s3259_s27 + $0xb8] sm:$0xff] }
  0x18   : > { %891 = vmatpush1.bf16.msra.mxu1 %v3072_v29  ;;  %v487_v46 = vpack.c.bf16 %v466_v44, %v465_v43  ;;  %v469_v49 = vld [vmem:[%s3259_s27 + $0xc0] sm:$0xff]  ;;  %v470_v50 = vld [vmem:[%s3259_s27 + $0xc8] sm:$0xff]  ;;  %v488_v51 = vpack.c.bf16 %v468_v48, %v467_v47  ;;  %v471_v53 = vld [vmem:[%s3259_s27 + $0xd0] sm:$0xff] }
  0x19   : > { %892 = vmatprep.subr.bf16.mxu1 %v3073_v31  ;;  %v489_v52 = vpack.c.bf16 %v470_v50, %v469_v49  ;;  %v472_v54 = vld [vmem:[%s3259_s27 + $0xd8] sm:$0xff]  ;;  %v473_v55 = vld [vmem:[%s3259_s27 + $0xe0] sm:$0xff]  ;;  %v474_v56 = vld [vmem:[%s3259_s27 + $0xe8] sm:$0xff] }
  0x1a   : > { %v490_v57 = vpack.c.bf16 %v472_v54, %v471_v53  ;;  %v491_v58 = vpack.c.bf16 %v474_v56, %v473_v55  ;;  %v475_v59 = vld [vmem:[%s3259_s27 + $0xf0] sm:$0xff]  ;;  %v476_v60 = vld [vmem:[%s3259_s27 + $0xf8] sm:$0xff]  ;;  %v3082_v9 = vld [vmem:[%s3897_s5 + $0x40] sm:$0xff]   ;;  %s3823_s27 = scalar_lea.vmem %s3905_s13, %s2582_s21 }
  0x1b   : > { %v492_v61 = vpack.c.bf16 %v476_v60, %v475_v59  ;;  %v3083_v10 = vld [vmem:[%s3897_s5] sm:$0xff]   ;;  %v3084_v11 = vld [vmem:[%s3897_s5 + $0x48] sm:$0xff]   ;;  %2699 = vmatprep.subr.bf16.mxu0 %v3082_v9  ;;  %v3086_v20 = vld [vmem:[%s3897_s5 + $0x50] sm:$0xff]  }
  0x1c   : > { %2956 = vmatmul.mubr.msk.bf16.gmra.mrb[4].mxu0 %vm516_vm0, %v480_v22  ;;  %893 = vmatpush1.bf16.msra.mxu1 %v3075_v32  ;;  %v3085_v17 = vld [vmem:[%s3897_s5 + $0x8] sm:$0xff]   ;;  %v3087_v26 = vld [vmem:[%s3897_s5 + $0x10] sm:$0xff]   ;;  %v3088_v29 = vld [vmem:[%s3897_s5 + $0x58] sm:$0xff]  }
  0x1d   : > { %2959 = vmatprep.mubr.msk.bf16.mxu0 %vm516_vm0, %v481_v23  ;;  %894 = vmatprep.subr.bf16.mxu1 %v3076_v62  ;;  %v3089_v36 = vld [vmem:[%s3897_s5 + $0x18] sm:$0xff]   ;;  %v3090_v38 = vld [vmem:[%s3897_s5 + $0x60] sm:$0xff]   ;;  %v3092_v47 = vld [vmem:[%s3897_s5 + $0x68] sm:$0xff]  }
  0x1e   : > { %2700 = vmatpush3.bf16.msra.mxu0 %v3083_v10  ;;  %v3091_v44 = vld [vmem:[%s3897_s5 + $0x20] sm:$0xff]   ;;  %v3093_v54 = vld [vmem:[%s3897_s5 + $0x28] sm:$0xff]   ;;  %v3094_v56 = vld [vmem:[%s3897_s5 + $0x70] sm:$0xff]  }
  0x1f   : > { %2701 = vmatprep.subr.bf16.mxu0 %v3084_v11  ;;  %v3095_v62 = vld [vmem:[%s3897_s5 + $0x30] sm:$0xff]  }
  0x20   : > { %895 = vmatpush1.bf16.msra.mxu1 %v3078_v63 }
  0x21   : > { %896 = vmatprep.subr.bf16.mxu1 %v3079_v0 }
  0x22   : > { %2702 = vmatpush3.bf16.msra.mxu0 %v3085_v17 }
  0x23   : > { %2703 = vmatprep.subr.bf16.mxu0 %v3086_v20 }
  0x24   : > { %2960 = vmatmul.mubr.msk.bf16.gmra.mrb[8].mxu0 %vm516_vm0, %v482_v33  ;;  %897 = vmatpush1.bf16.msra.mxu1 %v3081_v1 }
  0x25   : > { %2963 = vmatprep.mubr.msk.bf16.mxu0 %vm516_vm0, %v483_v34 }
  0x26   : > { %2704 = vmatpush3.bf16.msra.mxu0 %v3087_v26 }
  0x27   : > { %2705 = vmatprep.subr.bf16.mxu0 %v3088_v29 }
  0x2a   : > { %2706 = vmatpush3.bf16.msra.mxu0 %v3089_v36 }
  0x2b   : > { %2707 = vmatprep.subr.bf16.mxu0 %v3090_v38 }
  0x2c   : > { %2964 = vmatmul.mubr.msk.bf16.gmra.mrb[12].mxu0 %vm516_vm0, %v484_v39 }
  0x2d   : > { %2967 = vmatprep.mubr.msk.bf16.mxu0 %vm516_vm0, %v485_v40 }
  0x2e   : > { %2708 = vmatpush3.bf16.msra.mxu0 %v3091_v44 }
  0x2f   : > { %2709 = vmatprep.subr.bf16.mxu0 %v3092_v47 }
  0x32   : > { %2710 = vmatpush3.bf16.msra.mxu0 %v3093_v54 }
  0x33   : > { %2711 = vmatprep.subr.bf16.mxu0 %v3094_v56 }
  0x34   : > { %2968 = vmatmul.mubr.msk.bf16.gmra.mrb[16].mxu0 %vm516_vm0, %v486_v45 }
  0x35   : > { %2971 = vmatprep.mubr.msk.bf16.mxu0 %vm516_vm0, %v487_v46 }
  0x36   : > { %2712 = vmatpush3.bf16.msra.mxu0 %v3095_v62 }
  0x3c   : > { %2972 = vmatmul.mubr.msk.bf16.gmra.mrb[20].mxu0 %vm516_vm0, %v488_v51 }
  0x3d   : > { %2975 = vmatprep.mubr.msk.bf16.mxu0 %vm516_vm0, %v489_v52 }
  0x44   : > { %2976 = vmatmul.mubr.msk.bf16.gmra.mrb[24].mxu0 %vm516_vm0, %v490_v57 }
  0x45   : > { %2979 = vmatprep.mubr.msk.bf16.mxu0 %vm516_vm0, %v491_v58 }
  0x4c   : > { %2980 = vmatmul.mubr.msk.bf16.gmra.mrb[28].mxu0 %vm516_vm0, %v492_v61 }
  0xe7   : > { %v2953_v4 = vpop.f32.mrb[0].mxu0 }
  0xe8   : > { %v608_v5 = vadd.f32 %v2953_v4, %v3349_v3  ;;  %v599_v6 = vpop.f32.mrb[1].mxu0 }
  0xe9   : > { %v600_v7 = vadd.f32 %v3349_v3, %v599_v6  ;;  %v2954_v8 = vpop.f32.mrb[2].mxu0 }
  0xea   : > { %v611_v12 = vadd.f32 %v2954_v8, %v3349_v3  ;;  %v602_v13 = vpop.f32.mrb[3].mxu0  ;;  %v728_v15 = vmax.f32 %v608_v5, 0.0 }
  0xeb   : > { %v603_v14 = vadd.f32 %v3349_v3, %v602_v13  ;;  %v726_v18 = vmax.f32 %v600_v7, 0.0 }
  0xec   : > { %v729_v16 = vmax.f32 %v611_v12, 0.0 }
  0xed   : > { %v727_v19 = vmax.f32 %v603_v14, 0.0 }
  0xee   : > { %v759_v21 = vpack.c.bf16 %v729_v16, %v728_v15 }
  0xef   : > { %v758_v22 = vpack.c.bf16 %v727_v19, %v726_v18  ;;  %v2957_v23 = vpop.f32.mrb[4].mxu0 }
  0xf0   : > { %v624_v24 = vadd.f32 %v2957_v23, %v3349_v3  ;;  %v615_v25 = vpop.f32.mrb[5].mxu0 }
  0xf1   : > { %915 = vmatmul.mubr.bf16.vlgmr.msra.gmra.mrb[0].mxu1 %v758_v22  ;;  %v616_v27 = vadd.f32 %v3349_v3, %v615_v25  ;;  %v2958_v28 = vpop.f32.mrb[6].mxu0 }
  0xf2   : > { %v732_v30 = vmax.f32 %v624_v24, 0.0  ;;  %v627_v31 = vadd.f32 %v2958_v28, %v3349_v3  ;;  %v618_v32 = vpop.f32.mrb[7].mxu0  ;;  %924 = vmatprep.mubr.bf16.mxu1 %v3154_v2 }
  0xf3   : > { %v730_v33 = vmax.f32 %v616_v27, 0.0  ;;  %v619_v34 = vadd.f32 %v3349_v3, %v618_v32 }
  0xf4   : > { %v733_v35 = vmax.f32 %v627_v31, 0.0 }
  0xf5   : > { %v731_v37 = vmax.f32 %v619_v34, 0.0 }
  0xf6   : > { %v761_v39 = vpack.c.bf16 %v733_v35, %v732_v30 }
  0xf7   : > { %v760_v40 = vpack.c.bf16 %v731_v37, %v730_v33  ;;  %v2961_v41 = vpop.f32.mrb[8].mxu0 }
  0xf8   : > { %v640_v42 = vadd.f32 %v2961_v41, %v3349_v3  ;;  %v631_v43 = vpop.f32.mrb[9].mxu0 }
  0xf9   : > { %925 = vmatmul.mubr.bf16.gmra.mrb[4].mxu1 %v759_v21  ;;  %v632_v45 = vadd.f32 %v3349_v3, %v631_v43  ;;  %v2962_v46 = vpop.f32.mrb[10].mxu0 }
  0xfa   : > { %934 = vmatprep.mubr.bf16.mxu1 %v3154_v2  ;;  %v736_v48 = vmax.f32 %v640_v42, 0.0  ;;  %v643_v49 = vadd.f32 %v2962_v46, %v3349_v3  ;;  %v634_v50 = vpop.f32.mrb[11].mxu0 }
  0xfb   : > { %v734_v51 = vmax.f32 %v632_v45, 0.0  ;;  %v635_v52 = vadd.f32 %v3349_v3, %v634_v50 }
  0xfc   : > { %v737_v53 = vmax.f32 %v643_v49, 0.0 }
  0xfd   : > { %v735_v55 = vmax.f32 %v635_v52, 0.0 }
  0xfe   : > { %v763_v57 = vpack.c.bf16 %v737_v53, %v736_v48 }
  0xff   : > { %v762_v58 = vpack.c.bf16 %v735_v55, %v734_v51  ;;  %v2965_v59 = vpop.f32.mrb[12].mxu0 }
 0x100   : > { %v656_v60 = vadd.f32 %v2965_v59, %v3349_v3  ;;  %v647_v61 = vpop.f32.mrb[13].mxu0 }
 0x101   : > { %935 = vmatmul.mubr.bf16.gmra.mrb[8].mxu1 %v760_v40  ;;  %v648_v63 = vadd.f32 %v3349_v3, %v647_v61  ;;  %v2966_v0 = vpop.f32.mrb[14].mxu0 }
 0x102   : > { %944 = vmatprep.mubr.bf16.mxu1 %v3154_v2  ;;  %v740_v1 = vmax.f32 %v656_v60, 0.0  ;;  %v659_v4 = vadd.f32 %v2966_v0, %v3349_v3  ;;  %v650_v5 = vpop.f32.mrb[15].mxu0 }
 0x103   : > { %v738_v6 = vmax.f32 %v648_v63, 0.0  ;;  %v651_v7 = vadd.f32 %v3349_v3, %v650_v5 }
 0x104   : > { %v741_v8 = vmax.f32 %v659_v4, 0.0 }
 0x105   : > { %v739_v9 = vmax.f32 %v651_v7, 0.0  ;;  %v3098_v7 = vld [vmem:[%s3899_s7] ss:$8 sps:$4 sm:$0xff]  }
 0x106   : > { %v3412_v10 = vpack.c.bf16 %v741_v8, %v740_v1  ;;  %v3100_v8 = vld [vmem:[%s3899_s7 + $0x4] ss:$8 sps:$4 sm:$0xff]  }
 0x107   : > { %v764_v11 = vpack.c.bf16 %v739_v9, %v738_v6  ;;  %v2969_v12 = vpop.f32.mrb[16].mxu0  ;;  %v3097_v6 = vld [vmem:[%s3897_s5 + $0x38] sm:$0xff]   ;;  %1623 = vmatprep.subr.bf16.mxu1 %v3100_v8  ;;  %v792_v9 = vlaneseq }
 0x108   : > { %v672_v13 = vadd.f32 %v2969_v12, %v3349_v3  ;;  %v663_v14 = vpop.f32.mrb[17].mxu0  ;;  %1624 = vmatpush1.bf16.msra.mxu1 %v3098_v7  ;;  %v790_v12 = vld [vmem:[%s3896_s4] sm:$0x3] }
 0x109   : > { %945 = vmatmul.mubr.bf16.gmra.mrb[12].mxu1 %v761_v39  ;;  %v664_v15 = vadd.f32 %v3349_v3, %v663_v14  ;;  %v2970_v16 = vpop.f32.mrb[18].mxu0  ;;  %v3101_v14 = vld [vmem:[%s3899_s7 + $0x10] ss:$8 sps:$4 sm:$0xff]  }
 0x10a   : > { %954 = vmatprep.mubr.bf16.mxu1 %v3154_v2  ;;  %v744_v17 = vmax.f32 %v672_v13, 0.0  ;;  %v675_v18 = vadd.f32 %v2970_v16, %v3349_v3  ;;  %v666_v19 = vpop.f32.mrb[19].mxu0 }
 0x10b   : > { %v742_v20 = vmax.f32 %v664_v15, 0.0  ;;  %v667_v21 = vadd.f32 %v3349_v3, %v666_v19  ;;  %v3103_v15 = vld [vmem:[%s3899_s7 + $0x14] ss:$8 sps:$4 sm:$0xff]  }
 0x10c   : > { %v745_v22 = vmax.f32 %v675_v18, 0.0  ;;  %1625 = vmatprep.subr.bf16.mxu1 %v3103_v15 }
 0x10d   : > { %v743_v23 = vmax.f32 %v667_v21, 0.0  ;;  %1626 = vmatpush1.bf16.msra.mxu1 %v3101_v14 }
 0x10e   : > { %v767_v24 = vpack.c.bf16 %v745_v22, %v744_v17 }
 0x10f   : > { %v766_v25 = vpack.c.bf16 %v743_v23, %v742_v20  ;;  %v2973_v26 = vpop.f32.mrb[20].mxu0 }
 0x110   : > { %v688_v27 = vadd.f32 %v2973_v26, %v3349_v3  ;;  %v679_v28 = vpop.f32.mrb[21].mxu0  ;;  %v3106_v26 = vld [vmem:[%s3899_s7 + $0x24] ss:$8 sps:$4 sm:$0xff]  }
 0x111   : > { %955 = vmatmul.mubr.bf16.gmra.mrb[16].mxu1 %v762_v58  ;;  %v680_v29 = vadd.f32 %v3349_v3, %v679_v28  ;;  %v2974_v30 = vpop.f32.mrb[22].mxu0  ;;  %v3109_v28 = vld [vmem:[%s3899_s7 + $0x34] ss:$8 sps:$4 sm:$0xff]   ;;  %1627 = vmatprep.subr.bf16.mxu1 %v3106_v26 }
 0x112   : > { %964 = vmatprep.mubr.bf16.mxu1 %v3154_v2  ;;  %v748_v31 = vmax.f32 %v688_v27, 0.0  ;;  %v691_v32 = vadd.f32 %v2974_v30, %v3349_v3  ;;  %v682_v33 = vpop.f32.mrb[23].mxu0 }
 0x113   : > { %v746_v34 = vmax.f32 %v680_v29, 0.0  ;;  %v683_v35 = vadd.f32 %v3349_v3, %v682_v33  ;;  %v3107_v33 = vld [vmem:[%s3899_s7 + $0x30] ss:$8 sps:$4 sm:$0xff]  }
 0x114   : > { %v749_v36 = vmax.f32 %v691_v32, 0.0 }
 0x115   : > { %v747_v37 = vmax.f32 %v683_v35, 0.0  ;;  %v3112_v35 = vld [vmem:[%s3899_s7 + $0x44] ss:$8 sps:$4 sm:$0xff]  }
 0x116   : > { %v769_v38 = vpack.c.bf16 %v749_v36, %v748_v31 }
 0x117   : > { %v768_v39 = vpack.c.bf16 %v747_v37, %v746_v34  ;;  %v2977_v40 = vpop.f32.mrb[24].mxu0 }
 0x118   : > { %v704_v41 = vadd.f32 %v2977_v40, %v3349_v3  ;;  %v695_v42 = vpop.f32.mrb[25].mxu0 }
 0x119   : > { %965 = vmatmul.mubr.bf16.gmra.mrb[20].mxu1 %v763_v57  ;;  %v696_v43 = vadd.f32 %v3349_v3, %v695_v42  ;;  %v2978_v44 = vpop.f32.mrb[26].mxu0  ;;  %v3110_v42 = vld [vmem:[%s3899_s7 + $0x40] ss:$8 sps:$4 sm:$0xff]  }
 0x11a   : > { %974 = vmatprep.mubr.bf16.mxu1 %v3154_v2  ;;  %v752_v45 = vmax.f32 %v704_v41, 0.0  ;;  %v707_v46 = vadd.f32 %v2978_v44, %v3349_v3  ;;  %v698_v47 = vpop.f32.mrb[27].mxu0 }
 0x11b   : > { %v750_v48 = vmax.f32 %v696_v43, 0.0  ;;  %v699_v49 = vadd.f32 %v3349_v3, %v698_v47 }
 0x11c   : > { %v753_v50 = vmax.f32 %v707_v46, 0.0 }
 0x11d   : > { %v751_v51 = vmax.f32 %v699_v49, 0.0 }
 0x11e   : > { %v771_v52 = vpack.c.bf16 %v753_v50, %v752_v45  ;;  %v3115_v45 = vld [vmem:[%s3899_s7 + $0x54] ss:$8 sps:$4 sm:$0xff]  }
 0x11f   : > { %v770_v53 = vpack.c.bf16 %v751_v51, %v750_v48  ;;  %v2981_v54 = vpop.f32.mrb[28].mxu0  ;;  %v3113_v51 = vld [vmem:[%s3899_s7 + $0x50] ss:$8 sps:$4 sm:$0xff]  }
 0x120   : > { %v720_v55 = vadd.f32 %v2981_v54, %v3349_v3  ;;  %v711_v56 = vpop.f32.mrb[29].mxu0 }
 0x121   : > { %975 = vmatmul.mubr.bf16.gmra.mrb[24].mxu1 %v764_v11  ;;  %v712_v57 = vadd.f32 %v3349_v3, %v711_v56  ;;  %v2982_v58 = vpop.f32.mrb[30].mxu0 }
 0x122   : > { %984 = vmatprep.mubr.bf16.mxu1 %v3154_v2  ;;  %v756_v59 = vmax.f32 %v720_v55, 0.0  ;;  %v723_v60 = vadd.f32 %v2982_v58, %v3349_v3  ;;  %v714_v61 = vpop.f32.mrb[31].mxu0 }
 0x123   : > { %v754_v62 = vmax.f32 %v712_v57, 0.0  ;;  %v715_v63 = vadd.f32 %v3349_v3, %v714_v61  ;;  %v3096_v3 = vld [vmem:[%s3897_s5 + $0x78] sm:$0xff]  }
 0x124   : > { %v757_v0 = vmax.f32 %v723_v60, 0.0  ;;  %2713 = vmatprep.subr.bf16.mxu0 %v3096_v3  ;;  %v3116_v60 = vld [vmem:[%s3899_s7 + $0x60] ss:$8 sps:$4 sm:$0xff]  }
 0x125   : > { %v755_v1 = vmax.f32 %v715_v63, 0.0  ;;  %2714 = vmatpush3.bf16.msra.mxu0 %v3097_v6  ;;  %v3121_v63 = vld [vmem:[%s3899_s7 + $0x74] ss:$8 sps:$4 sm:$0xff]   ;;  %v3119_v6 = vld [vmem:[%s3899_s7 + $0x70] ss:$8 sps:$4 sm:$0xff]  }
 0x126   : > { %v773_v4 = vpack.c.bf16 %v757_v0, %v756_v59 }
 0x127   : > { %v772_v5 = vpack.c.bf16 %v755_v1, %v754_v62 }
 0x129   : > { %985 = vmatmul.mubr.bf16.gmra.mrb[28].mxu1 %v3412_v10  ;;  %v3456_v10 = vshrl.u32 %v792_v9, 7 }
 0x12a   : > { %994 = vmatprep.mubr.bf16.mxu1 %v3154_v2 }
 0x12b   : > { %v794_v11 = vsub.s32 0, %v3456_v10  ;;  %v798_v13 = vsub.s32 1, %v3456_v10 }
 0x12d   : > { %v3471_v16 = vrot.slane %v790_v12, %v794_v11  ;;  %v3475_v17 = vrot.slane %v790_v12, %v798_v13 }
 0x131   : > { %995 = vmatmul.mubr.bf16.gmra.mrb[32].mxu1 %v766_v25  ;;  %v3104_v25 = vld [vmem:[%s3899_s7 + $0x20] ss:$8 sps:$4 sm:$0xff]  }
 0x132   : > { %1004 = vmatprep.mubr.bf16.mxu1 %v3154_v2  ;;  %1628 = vmatpush1.bf16.msra.mxu1 %v3104_v25 }
 0x133   : > { %1629 = vmatprep.subr.bf16.mxu1 %v3109_v28 }
 0x136   : > { %1630 = vmatpush1.bf16.msra.mxu1 %v3107_v33 }
 0x137   : > { %1631 = vmatprep.subr.bf16.mxu1 %v3112_v35 }
 0x139   : > { %1005 = vmatmul.mubr.bf16.gmra.mrb[36].mxu1 %v767_v24 }
 0x13a   : > { %1014 = vmatprep.mubr.bf16.mxu1 %v3154_v2  ;;  %1632 = vmatpush1.bf16.msra.mxu1 %v3110_v42 }
 0x13b   : > { %1633 = vmatprep.subr.bf16.mxu1 %v3115_v45 }
 0x13e   : > { %1634 = vmatpush1.bf16.msra.mxu1 %v3113_v51 }
 0x141   : > { %1015 = vmatmul.mubr.bf16.gmra.mrb[40].mxu1 %v768_v39 }
 0x142   : > { %1024 = vmatprep.mubr.bf16.mxu1 %v3154_v2 }
 0x149   : > { %1025 = vmatmul.mubr.bf16.gmra.mrb[44].mxu1 %v769_v38 }
 0x14a   : > { %1034 = vmatprep.mubr.bf16.mxu1 %v3154_v2 }
 0x151   : > { %1035 = vmatmul.mubr.bf16.gmra.mrb[48].mxu1 %v770_v53  ;;  %v3118_v53 = vld [vmem:[%s3899_s7 + $0x64] ss:$8 sps:$4 sm:$0xff]  }
 0x152   : > { %1044 = vmatprep.mubr.bf16.mxu1 %v3154_v2  ;;  %1635 = vmatprep.subr.bf16.mxu1 %v3118_v53 }
 0x153   : > { %1636 = vmatpush1.bf16.msra.mxu1 %v3116_v60 }
 0x154   : > { %1637 = vmatprep.subr.bf16.mxu1 %v3121_v63 }
 0x157   : > { %1638 = vmatpush1.bf16.msra.mxu1 %v3119_v6 }
 0x159   : > { %1045 = vmatmul.mubr.bf16.gmra.mrb[52].mxu1 %v771_v52 }
 0x15a   : > { %1054 = vmatprep.mubr.bf16.mxu1 %v3154_v2 }
 0x161   : > { %1055 = vmatmul.mubr.bf16.gmra.mrb[56].mxu1 %v772_v5 }
 0x162   : > { %1064 = vmatprep.mubr.bf16.mxu1 %v3154_v2 }
 0x169   : > { %1065 = vmatmul.mubr.bf16.gmra.mrb[60].mxu1 %v773_v4 }
 0x16a   : > { %1655 = vmatprep.mubr.bf16.mxu1 %v3154_v2 }
 0x1c4   : > { %v916_v18 = vpop.f32.mrb[0].mxu1 }
 0x1c5   : > { %v917_v19 = vadd.f32 %v916_v18, %v3471_v16  ;;  %v918_v20 = vpop.f32.mrb[1].mxu1 }
 0x1c6   : > { %v919_v21 = vadd.f32 %v918_v20, %v3475_v17  ;;  %v920_v22 = vpop.f32.mrb[2].mxu1 }
 0x1c7   : > { %v921_v23 = vadd.f32 %v920_v22, %v3471_v16  ;;  %v922_v24 = vpop.f32.mrb[3].mxu1  ;;  %v1075_v29 = vmax.f32 %v917_v19, 0.0 }
 0x1c8   : > { %v923_v27 = vadd.f32 %v922_v24, %v3475_v17  ;;  %v1076_v31 = vmax.f32 %v919_v21, 0.0 }
 0x1c9   : > { %v1077_v30 = vmax.f32 %v921_v23, 0.0 }
 0x1ca   : > { %v1078_v32 = vmax.f32 %v923_v27, 0.0 }
 0x1cb   : > { %v1139_v34 = vpack.c.bf16 %v1077_v30, %v1075_v29 }
 0x1cc   : > { %v1140_v36 = vpack.c.bf16 %v1078_v32, %v1076_v31  ;;  %v926_v37 = vpop.f32.mrb[4].mxu1 }
 0x1cd   : > { %v927_v38 = vadd.f32 %v926_v37, %v3471_v16  ;;  %v928_v39 = vpop.f32.mrb[5].mxu1 }
 0x1ce   : > { %v929_v40 = vadd.f32 %v928_v39, %v3475_v17  ;;  %v930_v41 = vpop.f32.mrb[6].mxu1  ;;  %1338 = vmatprep.mubr.bf16.mxu0 %v1140_v36 }
 0x1cf   : > { %v931_v43 = vadd.f32 %v930_v41, %v3471_v16  ;;  %v932_v44 = vpop.f32.mrb[7].mxu1  ;;  %1339 = vmatmul.mubr.bf16.vlgmr.msra.gmra.mrb[32].mxu0 %v1139_v34  ;;  %v1079_v47 = vmax.f32 %v927_v38, 0.0 }
 0x1d0   : > { %v933_v46 = vadd.f32 %v932_v44, %v3475_v17  ;;  %v1080_v49 = vmax.f32 %v929_v40, 0.0 }
 0x1d1   : > { %v1081_v48 = vmax.f32 %v931_v43, 0.0 }
 0x1d2   : > { %v1082_v50 = vmax.f32 %v933_v46, 0.0 }
 0x1d3   : > { %v1141_v52 = vpack.c.bf16 %v1081_v48, %v1079_v47 }
 0x1d4   : > { %v1142_v54 = vpack.c.bf16 %v1082_v50, %v1080_v49  ;;  %v936_v55 = vpop.f32.mrb[8].mxu1 }
 0x1d5   : > { %v937_v56 = vadd.f32 %v936_v55, %v3471_v16  ;;  %v938_v57 = vpop.f32.mrb[9].mxu1 }
 0x1d6   : > { %v939_v58 = vadd.f32 %v938_v57, %v3475_v17  ;;  %v940_v59 = vpop.f32.mrb[10].mxu1  ;;  %1346 = vmatprep.mubr.bf16.mxu0 %v1142_v54 }
 0x1d7   : > { %v941_v61 = vadd.f32 %v940_v59, %v3471_v16  ;;  %v942_v62 = vpop.f32.mrb[11].mxu1  ;;  %1347 = vmatmul.mubr.bf16.gmra.mrb[36].mxu0 %v1141_v52  ;;  %v1083_v1 = vmax.f32 %v937_v56, 0.0 }
 0x1d8   : > { %v943_v0 = vadd.f32 %v942_v62, %v3475_v17  ;;  %v1084_v5 = vmax.f32 %v939_v58, 0.0 }
 0x1d9   : > { %v1085_v4 = vmax.f32 %v941_v61, 0.0 }
 0x1da   : > { %v1086_v3 = vmax.f32 %v943_v0, 0.0 }
 0x1db   : > { %v1143_v7 = vpack.c.bf16 %v1085_v4, %v1083_v1 }
 0x1dc   : > { %v1144_v8 = vpack.c.bf16 %v1086_v3, %v1084_v5  ;;  %v946_v9 = vpop.f32.mrb[12].mxu1 }
 0x1dd   : > { %v947_v12 = vadd.f32 %v946_v9, %v3471_v16  ;;  %v948_v14 = vpop.f32.mrb[13].mxu1 }
 0x1de   : > { %v949_v15 = vadd.f32 %v948_v14, %v3475_v17  ;;  %v950_v18 = vpop.f32.mrb[14].mxu1  ;;  %1354 = vmatprep.mubr.bf16.mxu0 %v1144_v8 }
 0x1df   : > { %v951_v19 = vadd.f32 %v950_v18, %v3471_v16  ;;  %v952_v20 = vpop.f32.mrb[15].mxu1  ;;  %1355 = vmatmul.mubr.bf16.gmra.mrb[40].mxu0 %v1143_v7  ;;  %v1087_v22 = vmax.f32 %v947_v12, 0.0 }
 0x1e0   : > { %v953_v21 = vadd.f32 %v952_v20, %v3475_v17  ;;  %v1088_v24 = vmax.f32 %v949_v15, 0.0 }
 0x1e1   : > { %v1089_v23 = vmax.f32 %v951_v19, 0.0 }
 0x1e2   : > { %v1090_v25 = vmax.f32 %v953_v21, 0.0 }
 0x1e3   : > { %v1145_v26 = vpack.c.bf16 %v1089_v23, %v1087_v22 }
 0x1e4   : > { %v1146_v27 = vpack.c.bf16 %v1090_v25, %v1088_v24  ;;  %v956_v28 = vpop.f32.mrb[16].mxu1 }
 0x1e5   : > { %v957_v29 = vadd.f32 %v956_v28, %v3471_v16  ;;  %v958_v30 = vpop.f32.mrb[17].mxu1 }
 0x1e6   : > { %v959_v31 = vadd.f32 %v958_v30, %v3475_v17  ;;  %v960_v32 = vpop.f32.mrb[18].mxu1  ;;  %1362 = vmatprep.mubr.bf16.mxu0 %v1146_v27 }
 0x1e7   : > { %v961_v33 = vadd.f32 %v960_v32, %v3471_v16  ;;  %v962_v34 = vpop.f32.mrb[19].mxu1  ;;  %1363 = vmatmul.mubr.bf16.gmra.mrb[44].mxu0 %v1145_v26  ;;  %v1091_v36 = vmax.f32 %v957_v29, 0.0 }
 0x1e8   : > { %v963_v35 = vadd.f32 %v962_v34, %v3475_v17  ;;  %v1092_v38 = vmax.f32 %v959_v31, 0.0 }
 0x1e9   : > { %v1093_v37 = vmax.f32 %v961_v33, 0.0 }
 0x1ea   : > { %v1094_v39 = vmax.f32 %v963_v35, 0.0 }
 0x1eb   : > { %v1147_v40 = vpack.c.bf16 %v1093_v37, %v1091_v36 }
 0x1ec   : > { %v1148_v41 = vpack.c.bf16 %v1094_v39, %v1092_v38  ;;  %v966_v42 = vpop.f32.mrb[20].mxu1 }
 0x1ed   : > { %v967_v43 = vadd.f32 %v966_v42, %v3471_v16  ;;  %v968_v44 = vpop.f32.mrb[21].mxu1 }
 0x1ee   : > { %v969_v45 = vadd.f32 %v968_v44, %v3475_v17  ;;  %v970_v46 = vpop.f32.mrb[22].mxu1  ;;  %1370 = vmatprep.mubr.bf16.mxu0 %v1148_v41 }
 0x1ef   : > { %v971_v47 = vadd.f32 %v970_v46, %v3471_v16  ;;  %v972_v48 = vpop.f32.mrb[23].mxu1  ;;  %1371 = vmatmul.mubr.bf16.gmra.mrb[48].mxu0 %v1147_v40  ;;  %v1095_v50 = vmax.f32 %v967_v43, 0.0 }
 0x1f0   : > { %v973_v49 = vadd.f32 %v972_v48, %v3475_v17  ;;  %v1096_v52 = vmax.f32 %v969_v45, 0.0 }
 0x1f1   : > { %v1097_v51 = vmax.f32 %v971_v47, 0.0 }
 0x1f2   : > { %v1098_v53 = vmax.f32 %v973_v49, 0.0 }
 0x1f3   : > { %v1149_v54 = vpack.c.bf16 %v1097_v51, %v1095_v50 }
 0x1f4   : > { %v1150_v55 = vpack.c.bf16 %v1098_v53, %v1096_v52  ;;  %v976_v56 = vpop.f32.mrb[24].mxu1 }
 0x1f5   : > { %v977_v57 = vadd.f32 %v976_v56, %v3471_v16  ;;  %v978_v58 = vpop.f32.mrb[25].mxu1 }
 0x1f6   : > { %v979_v59 = vadd.f32 %v978_v58, %v3475_v17  ;;  %v980_v60 = vpop.f32.mrb[26].mxu1  ;;  %1378 = vmatprep.mubr.bf16.mxu0 %v1150_v55 }
 0x1f7   : > { %v981_v61 = vadd.f32 %v980_v60, %v3471_v16  ;;  %v982_v62 = vpop.f32.mrb[27].mxu1  ;;  %1379 = vmatmul.mubr.bf16.gmra.mrb[52].mxu0 %v1149_v54  ;;  %v1099_v0 = vmax.f32 %v977_v57, 0.0 }
 0x1f8   : > { %v983_v63 = vadd.f32 %v982_v62, %v3475_v17  ;;  %v1100_v4 = vmax.f32 %v979_v59, 0.0 }
 0x1f9   : > { %v1101_v1 = vmax.f32 %v981_v61, 0.0 }
 0x1fa   : > { %v1102_v5 = vmax.f32 %v983_v63, 0.0 }
 0x1fb   : > { %v1151_v3 = vpack.c.bf16 %v1101_v1, %v1099_v0 }
 0x1fc   : > { %v1152_v6 = vpack.c.bf16 %v1102_v5, %v1100_v4  ;;  %v986_v7 = vpop.f32.mrb[28].mxu1 }
 0x1fd   : > { %v987_v8 = vadd.f32 %v986_v7, %v3471_v16  ;;  %v988_v9 = vpop.f32.mrb[29].mxu1 }
 0x1fe   : > { %v989_v12 = vadd.f32 %v988_v9, %v3475_v17  ;;  %v990_v14 = vpop.f32.mrb[30].mxu1  ;;  %1386 = vmatprep.mubr.bf16.mxu0 %v1152_v6 }
 0x1ff   : > { %v991_v15 = vadd.f32 %v990_v14, %v3471_v16  ;;  %v992_v18 = vpop.f32.mrb[31].mxu1  ;;  %1387 = vmatmul.mubr.bf16.gmra.mrb[56].mxu0 %v1151_v3  ;;  %v1103_v20 = vmax.f32 %v987_v8, 0.0 }
 0x200   : > { %v993_v19 = vadd.f32 %v992_v18, %v3475_v17  ;;  %v1104_v22 = vmax.f32 %v989_v12, 0.0 }
 0x201   : > { %v1105_v21 = vmax.f32 %v991_v15, 0.0 }
 0x202   : > { %v1106_v23 = vmax.f32 %v993_v19, 0.0 }
 0x203   : > { %v1153_v24 = vpack.c.bf16 %v1105_v21, %v1103_v20 }
 0x204   : > { %v1154_v25 = vpack.c.bf16 %v1106_v23, %v1104_v22  ;;  %v996_v26 = vpop.f32.mrb[32].mxu1 }
 0x205   : > { %v997_v27 = vadd.f32 %v996_v26, %v3471_v16  ;;  %v998_v28 = vpop.f32.mrb[33].mxu1 }
 0x206   : > { %v999_v29 = vadd.f32 %v998_v28, %v3475_v17  ;;  %v1000_v30 = vpop.f32.mrb[34].mxu1  ;;  %1394 = vmatprep.mubr.bf16.mxu0 %v1154_v25 }
 0x207   : > { %v1001_v31 = vadd.f32 %v1000_v30, %v3471_v16  ;;  %v1002_v32 = vpop.f32.mrb[35].mxu1  ;;  %1395 = vmatmul.mubr.bf16.gmra.mrb[60].mxu0 %v1153_v24  ;;  %v1107_v34 = vmax.f32 %v997_v27, 0.0 }
 0x208   : > { %v1003_v33 = vadd.f32 %v1002_v32, %v3475_v17  ;;  %v1108_v36 = vmax.f32 %v999_v29, 0.0 }
 0x209   : > { %v1109_v35 = vmax.f32 %v1001_v31, 0.0 }
 0x20a   : > { %v1110_v37 = vmax.f32 %v1003_v33, 0.0 }
 0x20b   : > { %v1155_v38 = vpack.c.bf16 %v1109_v35, %v1107_v34 }
 0x20c   : > { %v1156_v39 = vpack.c.bf16 %v1110_v37, %v1108_v36  ;;  %v1006_v40 = vpop.f32.mrb[36].mxu1 }
 0x20d   : > { %v1007_v41 = vadd.f32 %v1006_v40, %v3471_v16  ;;  %v1008_v42 = vpop.f32.mrb[37].mxu1 }
 0x20e   : > { %v1009_v43 = vadd.f32 %v1008_v42, %v3475_v17  ;;  %v1010_v44 = vpop.f32.mrb[38].mxu1  ;;  %1402 = vmatprep.mubr.bf16.mxu0 %v1156_v39 }
 0x20f   : > { %v1011_v45 = vadd.f32 %v1010_v44, %v3471_v16  ;;  %v1012_v46 = vpop.f32.mrb[39].mxu1  ;;  %1403 = vmatmul.mubr.bf16.gmra.mrb[64].mxu0 %v1155_v38  ;;  %v1111_v48 = vmax.f32 %v1007_v41, 0.0 }
 0x210   : > { %v1013_v47 = vadd.f32 %v1012_v46, %v3475_v17  ;;  %v1112_v50 = vmax.f32 %v1009_v43, 0.0 }
 0x211   : > { %v1113_v49 = vmax.f32 %v1011_v45, 0.0 }
 0x212   : > { %v1114_v51 = vmax.f32 %v1013_v47, 0.0 }
 0x213   : > { %v1157_v52 = vpack.c.bf16 %v1113_v49, %v1111_v48 }
 0x214   : > { %v1158_v53 = vpack.c.bf16 %v1114_v51, %v1112_v50  ;;  %v1016_v54 = vpop.f32.mrb[40].mxu1 }
 0x215   : > { %v1017_v55 = vadd.f32 %v1016_v54, %v3471_v16  ;;  %v1018_v56 = vpop.f32.mrb[41].mxu1 }
 0x216   : > { %v1019_v57 = vadd.f32 %v1018_v56, %v3475_v17  ;;  %v1020_v58 = vpop.f32.mrb[42].mxu1  ;;  %1410 = vmatprep.mubr.bf16.mxu0 %v1158_v53 }
 0x217   : > { %v1021_v59 = vadd.f32 %v1020_v58, %v3471_v16  ;;  %v1022_v60 = vpop.f32.mrb[43].mxu1  ;;  %1411 = vmatmul.mubr.bf16.gmra.mrb[68].mxu0 %v1157_v52  ;;  %v1115_v62 = vmax.f32 %v1017_v55, 0.0 }
 0x218   : > { %v1023_v61 = vadd.f32 %v1022_v60, %v3475_v17  ;;  %v1116_v0 = vmax.f32 %v1019_v57, 0.0 }
 0x219   : > { %v1117_v63 = vmax.f32 %v1021_v59, 0.0 }
 0x21a   : > { %v1118_v1 = vmax.f32 %v1023_v61, 0.0 }
 0x21b   : > { %v1159_v4 = vpack.c.bf16 %v1117_v63, %v1115_v62 }
 0x21c   : > { %v1160_v5 = vpack.c.bf16 %v1118_v1, %v1116_v0  ;;  %v1026_v3 = vpop.f32.mrb[44].mxu1 }
 0x21d   : > { %v1027_v6 = vadd.f32 %v1026_v3, %v3471_v16  ;;  %v1028_v7 = vpop.f32.mrb[45].mxu1 }
 0x21e   : > { %v1029_v8 = vadd.f32 %v1028_v7, %v3475_v17  ;;  %v1030_v9 = vpop.f32.mrb[46].mxu1  ;;  %1418 = vmatprep.mubr.bf16.mxu0 %v1160_v5 }
 0x21f   : > { %v1031_v12 = vadd.f32 %v1030_v9, %v3471_v16  ;;  %v1032_v14 = vpop.f32.mrb[47].mxu1  ;;  %1419 = vmatmul.mubr.bf16.gmra.mrb[72].mxu0 %v1159_v4  ;;  %v1119_v18 = vmax.f32 %v1027_v6, 0.0 }
 0x220   : > { %v1033_v15 = vadd.f32 %v1032_v14, %v3475_v17  ;;  %v1120_v20 = vmax.f32 %v1029_v8, 0.0 }
 0x221   : > { %v1121_v19 = vmax.f32 %v1031_v12, 0.0 }
 0x222   : > { %v1122_v21 = vmax.f32 %v1033_v15, 0.0 }
 0x223   : > { %v1161_v22 = vpack.c.bf16 %v1121_v19, %v1119_v18 }
 0x224   : > { %v1162_v23 = vpack.c.bf16 %v1122_v21, %v1120_v20  ;;  %v1036_v24 = vpop.f32.mrb[48].mxu1 }
 0x225   : > { %v1037_v25 = vadd.f32 %v1036_v24, %v3471_v16  ;;  %v1038_v26 = vpop.f32.mrb[49].mxu1 }
 0x226   : > { %v1039_v27 = vadd.f32 %v1038_v26, %v3475_v17  ;;  %v1040_v28 = vpop.f32.mrb[50].mxu1  ;;  %1426 = vmatprep.mubr.bf16.mxu0 %v1162_v23  ;;  %v3125_v23 = vld [vmem:[%s3901_s9 + $0x8] sm:$0xff]  }
 0x227   : > { %v1041_v29 = vadd.f32 %v1040_v28, %v3471_v16  ;;  %v1042_v30 = vpop.f32.mrb[51].mxu1  ;;  %1427 = vmatmul.mubr.bf16.gmra.mrb[76].mxu0 %v1161_v22  ;;  %v1123_v32 = vmax.f32 %v1037_v25, 0.0  ;;  %v3122_v22 = vld [vmem:[%s3901_s9 + $0x40] sm:$0xff]  }
 0x228   : > { %v1043_v31 = vadd.f32 %v1042_v30, %v3475_v17  ;;  %v1124_v34 = vmax.f32 %v1039_v27, 0.0  ;;  %2811 = vmatprep.subr.bf16.mxu0 %v3122_v22  ;;  %v3592_v25 = vld [vmem:[%s3898_s6] ss:$0 sm:$0xff] }
 0x229   : > { %v1125_v33 = vmax.f32 %v1041_v29, 0.0 }
 0x22a   : > { %v1126_v35 = vmax.f32 %v1043_v31, 0.0 }
 0x22b   : > { %v1163_v36 = vpack.c.bf16 %v1125_v33, %v1123_v32  ;;  %v3126_v32 = vld [vmem:[%s3901_s9 + $0x50] sm:$0xff]  }
 0x22c   : > { %v1164_v37 = vpack.c.bf16 %v1126_v35, %v1124_v34  ;;  %v1046_v38 = vpop.f32.mrb[52].mxu1  ;;  %v3127_v33 = vld [vmem:[%s3901_s9 + $0x10] sm:$0xff]   ;;  %v3128_v34 = vld [vmem:[%s3901_s9 + $0x58] sm:$0xff]  }
 0x22d   : > { %v1047_v39 = vadd.f32 %v1046_v38, %v3471_v16  ;;  %v1048_v40 = vpop.f32.mrb[53].mxu1 }
 0x22e   : > { %v1049_v41 = vadd.f32 %v1048_v40, %v3475_v17  ;;  %v1050_v42 = vpop.f32.mrb[54].mxu1  ;;  %1434 = vmatprep.mubr.bf16.mxu0 %v1164_v37  ;;  %v3130_v40 = vld [vmem:[%s3901_s9 + $0x60] sm:$0xff]  }
 0x22f   : > { %v1051_v43 = vadd.f32 %v1050_v42, %v3471_v16  ;;  %v1052_v44 = vpop.f32.mrb[55].mxu1  ;;  %1435 = vmatmul.mubr.bf16.gmra.mrb[80].mxu0 %v1163_v36  ;;  %v1127_v46 = vmax.f32 %v1047_v39, 0.0  ;;  %v3129_v36 = vld [vmem:[%s3901_s9 + $0x18] sm:$0xff]  }
 0x230   : > { %v1053_v45 = vadd.f32 %v1052_v44, %v3475_v17  ;;  %v1128_v48 = vmax.f32 %v1049_v41, 0.0 }
 0x231   : > { %v1129_v47 = vmax.f32 %v1051_v43, 0.0 }
 0x232   : > { %v1130_v49 = vmax.f32 %v1053_v45, 0.0 }
 0x233   : > { %v1165_v50 = vpack.c.bf16 %v1129_v47, %v1127_v46  ;;  %v3131_v46 = vld [vmem:[%s3901_s9 + $0x20] sm:$0xff]  }
 0x234   : > { %v1166_v51 = vpack.c.bf16 %v1130_v49, %v1128_v48  ;;  %v1056_v52 = vpop.f32.mrb[56].mxu1  ;;  %v3132_v49 = vld [vmem:[%s3901_s9 + $0x68] sm:$0xff]  }
 0x235   : > { %v1057_v53 = vadd.f32 %v1056_v52, %v3471_v16  ;;  %v1058_v54 = vpop.f32.mrb[57].mxu1 }
 0x236   : > { %v1059_v55 = vadd.f32 %v1058_v54, %v3475_v17  ;;  %v1060_v56 = vpop.f32.mrb[58].mxu1  ;;  %1442 = vmatprep.mubr.bf16.mxu0 %v1166_v51  ;;  %v3133_v51 = vld [vmem:[%s3901_s9 + $0x28] sm:$0xff]  }
 0x237   : > { %v1061_v57 = vadd.f32 %v1060_v56, %v3471_v16  ;;  %v1062_v58 = vpop.f32.mrb[59].mxu1  ;;  %1443 = vmatmul.mubr.bf16.gmra.mrb[84].mxu0 %v1165_v50  ;;  %v1131_v60 = vmax.f32 %v1057_v53, 0.0 }
 0x238   : > { %v1063_v59 = vadd.f32 %v1062_v58, %v3475_v17  ;;  %v1132_v62 = vmax.f32 %v1059_v55, 0.0  ;;  %v3134_v55 = vld [vmem:[%s3901_s9 + $0x70] sm:$0xff]  }
 0x239   : > { %v1133_v61 = vmax.f32 %v1061_v57, 0.0 }
 0x23a   : > { %v1134_v63 = vmax.f32 %v1063_v59, 0.0 }
 0x23b   : > { %v1167_v0 = vpack.c.bf16 %v1133_v61, %v1131_v60  ;;  %v3135_v61 = vld [vmem:[%s3901_s9 + $0x30] sm:$0xff]  }
 0x23c   : > { %v1168_v1 = vpack.c.bf16 %v1134_v63, %v1132_v62  ;;  %v1066_v4 = vpop.f32.mrb[60].mxu1 }
 0x23d   : > { %v1067_v5 = vadd.f32 %v1066_v4, %v3471_v16  ;;  %v1068_v3 = vpop.f32.mrb[61].mxu1  ;;  %v3137_v4 = vld [vmem:[%s3901_s9 + $0x38] sm:$0xff]  }
 0x23e   : > { %v1069_v6 = vadd.f32 %v1068_v3, %v3475_v17  ;;  %v1070_v7 = vpop.f32.mrb[62].mxu1  ;;  %1450 = vmatprep.mubr.bf16.mxu0 %v1168_v1 }
 0x23f   : > { %v1071_v8 = vadd.f32 %v1070_v7, %v3471_v16  ;;  %v1072_v9 = vpop.f32.mrb[63].mxu1  ;;  %1451 = vmatmul.mubr.bf16.gmra.mrb[88].mxu0 %v1167_v0  ;;  %v1135_v14 = vmax.f32 %v1067_v5, 0.0  ;;  %v3123_v16 = vld [vmem:[%s3901_s9] sm:$0xff]   ;;  %v3136_v0 = vld [vmem:[%s3901_s9 + $0x78] sm:$0xff]  }
 0x240   : > { %v1073_v12 = vadd.f32 %v1072_v9, %v3475_v17  ;;  %v1136_v18 = vmax.f32 %v1069_v6, 0.0  ;;  %2812 = vmatpush3.bf16.msra.mxu0 %v3123_v16  ;;  %v3124_v17 = vld [vmem:[%s3901_s9 + $0x48] sm:$0xff]  }
 0x241   : > { %v1137_v15 = vmax.f32 %v1071_v8, 0.0  ;;  %2813 = vmatprep.subr.bf16.mxu0 %v3124_v17 }
 0x242   : > { %v1138_v19 = vmax.f32 %v1073_v12, 0.0 }
 0x243   : > { %v1169_v20 = vpack.c.bf16 %v1137_v15, %v1135_v14 }
 0x244   : > { %v1170_v21 = vpack.c.bf16 %v1138_v19, %v1136_v18  ;;  %2814 = vmatpush3.bf16.msra.mxu0 %v3125_v23 }
 0x245   : > { %2815 = vmatprep.subr.bf16.mxu0 %v3126_v32 }
 0x246   : > { %1458 = vmatprep.mubr.bf16.mxu0 %v1170_v21 }
 0x247   : > { %1459 = vmatmul.mubr.bf16.gmra.mrb[92].mxu0 %v1169_v20 }
 0x248   : > { %2816 = vmatpush3.bf16.msra.mxu0 %v3127_v33 }
 0x249   : > { %2817 = vmatprep.subr.bf16.mxu0 %v3128_v34 }
 0x24c   : > { %2818 = vmatpush3.bf16.msra.mxu0 %v3129_v36 }
 0x24d   : > { %2819 = vmatprep.subr.bf16.mxu0 %v3130_v40 }
 0x250   : > { %2820 = vmatpush3.bf16.msra.mxu0 %v3131_v46 }
 0x251   : > { %2821 = vmatprep.subr.bf16.mxu0 %v3132_v49 }
 0x254   : > { %2822 = vmatpush3.bf16.msra.mxu0 %v3133_v51 }
 0x255   : > { %2823 = vmatprep.subr.bf16.mxu0 %v3134_v55 }
 0x258   : > { %2824 = vmatpush3.bf16.msra.mxu0 %v3135_v61 }
 0x259   : > { %2825 = vmatprep.subr.bf16.mxu0 %v3136_v0 }
 0x25c   : > { %2826 = vmatpush3.bf16.msra.mxu0 %v3137_v4 }
 0x2a2   : > { %v2715_v24 = vpop.f32.mrb[32].mxu0 }
 0x2a3   : > { %v2716_v26 = vpop.f32.mrb[33].mxu0 }
 0x2a4   : > { %v2717_v27 = vadd.f32 %v2716_v26, %v2715_v24  ;;  %v2718_v28 = vpop.f32.mrb[34].mxu0 }
 0x2a5   : > { %v2719_v29 = vpop.f32.mrb[35].mxu0 }
 0x2a6   : > { %v1341_v30 = vadd.f32 %v2717_v27, %v3592_v25  ;;  %v2720_v31 = vadd.f32 %v2719_v29, %v2718_v28 }
 0x2a8   : > { %v1344_v35 = vadd.f32 %v2720_v31, %v3592_v25  ;;  %v1467_v37 = vmax.f32 %v1341_v30, 0.0 }
 0x2aa   : > { %v1468_v38 = vmax.f32 %v1344_v35, 0.0  ;;  %v2721_v39 = vpop.f32.mrb[36].mxu0 }
 0x2ab   : > { %v2722_v41 = vpop.f32.mrb[37].mxu0 }
 0x2ac   : > { %v1499_v42 = vpack.c.bf16 %v1468_v38, %v1467_v37  ;;  %v2723_v43 = vadd.f32 %v2722_v41, %v2721_v39  ;;  %v2724_v44 = vpop.f32.mrb[38].mxu0 }
 0x2ad   : > { %v2725_v45 = vpop.f32.mrb[39].mxu0 }
 0x2ae   : > { %v1349_v47 = vadd.f32 %v2723_v43, %v3592_v25  ;;  %v2726_v48 = vadd.f32 %v2725_v45, %v2724_v44  ;;  %1656 = vmatmul.mubr.bf16.vlgmr.msra.gmra.mrb[64].mxu1 %v1499_v42 }
 0x2af   : > { %1665 = vmatprep.mubr.bf16.mxu1 %v3154_v2 }
 0x2b0   : > { %v1352_v50 = vadd.f32 %v2726_v48, %v3592_v25  ;;  %v1469_v52 = vmax.f32 %v1349_v47, 0.0 }
 0x2b2   : > { %v1470_v53 = vmax.f32 %v1352_v50, 0.0  ;;  %v2727_v54 = vpop.f32.mrb[40].mxu0 }
 0x2b3   : > { %v2728_v56 = vpop.f32.mrb[41].mxu0 }
 0x2b4   : > { %v2729_v57 = vadd.f32 %v2728_v56, %v2727_v54  ;;  %v2730_v58 = vpop.f32.mrb[42].mxu0  ;;  %v1500_v59 = vpack.c.bf16 %v1470_v53, %v1469_v52 }
 0x2b5   : > { %v2731_v60 = vpop.f32.mrb[43].mxu0 }
 0x2b6   : > { %v1357_v62 = vadd.f32 %v2729_v57, %v3592_v25  ;;  %v2732_v63 = vadd.f32 %v2731_v60, %v2730_v58  ;;  %1666 = vmatmul.mubr.bf16.gmra.mrb[68].mxu1 %v1500_v59 }
 0x2b7   : > { %1675 = vmatprep.mubr.bf16.mxu1 %v3154_v2 }
 0x2b8   : > { %v1360_v1 = vadd.f32 %v2732_v63, %v3592_v25  ;;  %v1471_v5 = vmax.f32 %v1357_v62, 0.0 }
 0x2ba   : > { %v1472_v3 = vmax.f32 %v1360_v1, 0.0  ;;  %v2733_v6 = vpop.f32.mrb[44].mxu0 }
 0x2bb   : > { %v2734_v7 = vpop.f32.mrb[45].mxu0 }
 0x2bc   : > { %v2735_v8 = vadd.f32 %v2734_v7, %v2733_v6  ;;  %v2736_v9 = vpop.f32.mrb[46].mxu0  ;;  %v1501_v12 = vpack.c.bf16 %v1472_v3, %v1471_v5 }
 0x2bd   : > { %v2737_v14 = vpop.f32.mrb[47].mxu0 }
 0x2be   : > { %v1365_v15 = vadd.f32 %v2735_v8, %v3592_v25  ;;  %v2738_v18 = vadd.f32 %v2737_v14, %v2736_v9  ;;  %1676 = vmatmul.mubr.bf16.gmra.mrb[72].mxu1 %v1501_v12 }
 0x2bf   : > { %1685 = vmatprep.mubr.bf16.mxu1 %v3154_v2 }
 0x2c0   : > { %v1368_v19 = vadd.f32 %v2738_v18, %v3592_v25  ;;  %v1473_v20 = vmax.f32 %v1365_v15, 0.0 }
 0x2c2   : > { %v1474_v21 = vmax.f32 %v1368_v19, 0.0  ;;  %v2739_v22 = vpop.f32.mrb[48].mxu0 }
 0x2c3   : > { %v2740_v16 = vpop.f32.mrb[49].mxu0 }
 0x2c4   : > { %v2741_v17 = vadd.f32 %v2740_v16, %v2739_v22  ;;  %v2742_v23 = vpop.f32.mrb[50].mxu0  ;;  %v1502_v24 = vpack.c.bf16 %v1474_v21, %v1473_v20 }
 0x2c5   : > { %v2743_v26 = vpop.f32.mrb[51].mxu0 }
 0x2c6   : > { %v1373_v27 = vadd.f32 %v2741_v17, %v3592_v25  ;;  %v2744_v28 = vadd.f32 %v2743_v26, %v2742_v23  ;;  %1686 = vmatmul.mubr.bf16.gmra.mrb[76].mxu1 %v1502_v24 }
 0x2c7   : > { %1695 = vmatprep.mubr.bf16.mxu1 %v3154_v2 }
 0x2c8   : > { %v1376_v29 = vadd.f32 %v2744_v28, %v3592_v25  ;;  %v1475_v30 = vmax.f32 %v1373_v27, 0.0 }
 0x2ca   : > { %v1476_v31 = vmax.f32 %v1376_v29, 0.0  ;;  %v2745_v32 = vpop.f32.mrb[52].mxu0 }
 0x2cb   : > { %v2746_v33 = vpop.f32.mrb[53].mxu0 }
 0x2cc   : > { %v2747_v34 = vadd.f32 %v2746_v33, %v2745_v32  ;;  %v2748_v35 = vpop.f32.mrb[54].mxu0  ;;  %v1503_v36 = vpack.c.bf16 %v1476_v31, %v1475_v30 }
 0x2cd   : > { %v2749_v37 = vpop.f32.mrb[55].mxu0 }
 0x2ce   : > { %v1381_v38 = vadd.f32 %v2747_v34, %v3592_v25  ;;  %v2750_v39 = vadd.f32 %v2749_v37, %v2748_v35  ;;  %1696 = vmatmul.mubr.bf16.gmra.mrb[80].mxu1 %v1503_v36 }
 0x2cf   : > { %1705 = vmatprep.mubr.bf16.mxu1 %v3154_v2 }
 0x2d0   : > { %v1384_v40 = vadd.f32 %v2750_v39, %v3592_v25  ;;  %v1477_v41 = vmax.f32 %v1381_v38, 0.0 }
 0x2d2   : > { %v1478_v42 = vmax.f32 %v1384_v40, 0.0  ;;  %v2751_v43 = vpop.f32.mrb[56].mxu0 }
 0x2d3   : > { %v2752_v44 = vpop.f32.mrb[57].mxu0 }
 0x2d4   : > { %v2753_v45 = vadd.f32 %v2752_v44, %v2751_v43  ;;  %v2754_v46 = vpop.f32.mrb[58].mxu0  ;;  %v1504_v47 = vpack.c.bf16 %v1478_v42, %v1477_v41 }
 0x2d5   : > { %v2755_v48 = vpop.f32.mrb[59].mxu0 }
 0x2d6   : > { %v1389_v49 = vadd.f32 %v2753_v45, %v3592_v25  ;;  %v2756_v50 = vadd.f32 %v2755_v48, %v2754_v46  ;;  %1706 = vmatmul.mubr.bf16.gmra.mrb[84].mxu1 %v1504_v47 }
 0x2d7   : > { %1715 = vmatprep.mubr.bf16.mxu1 %v3154_v2 }
 0x2d8   : > { %v1392_v51 = vadd.f32 %v2756_v50, %v3592_v25  ;;  %v1479_v52 = vmax.f32 %v1389_v49, 0.0 }
 0x2da   : > { %v1480_v53 = vmax.f32 %v1392_v51, 0.0  ;;  %v2757_v54 = vpop.f32.mrb[60].mxu0 }
 0x2db   : > { %v2758_v55 = vpop.f32.mrb[61].mxu0 }
 0x2dc   : > { %v2759_v56 = vadd.f32 %v2758_v55, %v2757_v54  ;;  %v2760_v57 = vpop.f32.mrb[62].mxu0  ;;  %v1505_v58 = vpack.c.bf16 %v1480_v53, %v1479_v52 }
 0x2dd   : > { %v2761_v59 = vpop.f32.mrb[63].mxu0 }
 0x2de   : > { %v1397_v60 = vadd.f32 %v2759_v56, %v3592_v25  ;;  %v2762_v61 = vadd.f32 %v2761_v59, %v2760_v57  ;;  %1716 = vmatmul.mubr.bf16.gmra.mrb[88].mxu1 %v1505_v58 }
 0x2df   : > { %1725 = vmatprep.mubr.bf16.mxu1 %v3154_v2 }
 0x2e0   : > { %v1400_v62 = vadd.f32 %v2762_v61, %v3592_v25  ;;  %v1481_v63 = vmax.f32 %v1397_v60, 0.0 }
 0x2e2   : > { %v1482_v0 = vmax.f32 %v1400_v62, 0.0  ;;  %v2763_v1 = vpop.f32.mrb[64].mxu0 }
 0x2e3   : > { %v2764_v4 = vpop.f32.mrb[65].mxu0 }
 0x2e4   : > { %v2765_v5 = vadd.f32 %v2764_v4, %v2763_v1  ;;  %v2766_v3 = vpop.f32.mrb[66].mxu0  ;;  %v1506_v6 = vpack.c.bf16 %v1482_v0, %v1481_v63 }
 0x2e5   : > { %v2767_v7 = vpop.f32.mrb[67].mxu0 }
 0x2e6   : > { %v1405_v8 = vadd.f32 %v2765_v5, %v3592_v25  ;;  %v2768_v9 = vadd.f32 %v2767_v7, %v2766_v3  ;;  %1726 = vmatmul.mubr.bf16.gmra.mrb[92].mxu1 %v1506_v6 }
 0x2e7   : > { %1735 = vmatprep.mubr.bf16.mxu1 %v3154_v2 }
 0x2e8   : > { %v1408_v12 = vadd.f32 %v2768_v9, %v3592_v25  ;;  %v1483_v14 = vmax.f32 %v1405_v8, 0.0 }
 0x2ea   : > { %v1484_v15 = vmax.f32 %v1408_v12, 0.0  ;;  %v2769_v18 = vpop.f32.mrb[68].mxu0 }
 0x2eb   : > { %v2770_v19 = vpop.f32.mrb[69].mxu0 }
 0x2ec   : > { %v2771_v20 = vadd.f32 %v2770_v19, %v2769_v18  ;;  %v2772_v21 = vpop.f32.mrb[70].mxu0  ;;  %v1507_v22 = vpack.c.bf16 %v1484_v15, %v1483_v14 }
 0x2ed   : > { %v2773_v16 = vpop.f32.mrb[71].mxu0 }
 0x2ee   : > { %v1413_v17 = vadd.f32 %v2771_v20, %v3592_v25  ;;  %v2774_v23 = vadd.f32 %v2773_v16, %v2772_v21  ;;  %1736 = vmatmul.mubr.bf16.gmra.mrb[96].mxu1 %v1507_v22 }
 0x2ef   : > { %1745 = vmatprep.mubr.bf16.mxu1 %v3154_v2 }
 0x2f0   : > { %v1416_v24 = vadd.f32 %v2774_v23, %v3592_v25  ;;  %v1485_v26 = vmax.f32 %v1413_v17, 0.0 }
 0x2f2   : > { %v1486_v27 = vmax.f32 %v1416_v24, 0.0  ;;  %v2775_v28 = vpop.f32.mrb[72].mxu0 }
 0x2f3   : > { %v2776_v29 = vpop.f32.mrb[73].mxu0 }
 0x2f4   : > { %v2777_v30 = vadd.f32 %v2776_v29, %v2775_v28  ;;  %v2778_v31 = vpop.f32.mrb[74].mxu0  ;;  %v1508_v32 = vpack.c.bf16 %v1486_v27, %v1485_v26 }
 0x2f5   : > { %v2779_v33 = vpop.f32.mrb[75].mxu0 }
 0x2f6   : > { %v1421_v34 = vadd.f32 %v2777_v30, %v3592_v25  ;;  %v2780_v35 = vadd.f32 %v2779_v33, %v2778_v31  ;;  %1746 = vmatmul.mubr.bf16.gmra.mrb[100].mxu1 %v1508_v32 }
 0x2f7   : > { %1755 = vmatprep.mubr.bf16.mxu1 %v3154_v2 }
 0x2f8   : > { %v1424_v36 = vadd.f32 %v2780_v35, %v3592_v25  ;;  %v1487_v37 = vmax.f32 %v1421_v34, 0.0 }
 0x2fa   : > { %v1488_v38 = vmax.f32 %v1424_v36, 0.0  ;;  %v2781_v39 = vpop.f32.mrb[76].mxu0  ;;  %v1531_v36 = vld [vmem:[%s3900_s8] sm:$0x3] }
 0x2fb   : > { %v2782_v40 = vpop.f32.mrb[77].mxu0 }
 0x2fc   : > { %v2783_v41 = vadd.f32 %v2782_v40, %v2781_v39  ;;  %v2784_v42 = vpop.f32.mrb[78].mxu0  ;;  %v1509_v43 = vpack.c.bf16 %v1488_v38, %v1487_v37  ;;  %v3682_v37 = vrot.slane %v1531_v36, %v794_v11  ;;  %v3686_v38 = vrot.slane %v1531_v36, %v798_v13  ;;  %v3139_v13 = vld [vmem:[%s3903_s11 + $0x8] sm:$0xff]  }
 0x2fd   : > { %v2785_v44 = vpop.f32.mrb[79].mxu0 }
 0x2fe   : > { %v1429_v45 = vadd.f32 %v2783_v41, %v3592_v25  ;;  %v2786_v46 = vadd.f32 %v2785_v44, %v2784_v42  ;;  %1756 = vmatmul.mubr.bf16.gmra.mrb[104].mxu1 %v1509_v43  ;;  %v3138_v44 = vld [vmem:[%s3903_s11] sm:$0xff]  }
 0x2ff   : > { %1765 = vmatprep.mubr.bf16.mxu1 %v3154_v2  ;;  %3031 = vmatprep.subr.bf16.mxu1 %v3138_v44 }
 0x300   : > { %v1432_v47 = vadd.f32 %v2786_v46, %v3592_v25  ;;  %v1489_v48 = vmax.f32 %v1429_v45, 0.0  ;;  %2983 = vmatprep.subr.bf16.mxu0 %v3138_v44  ;;  %3039 = vmatpush3.bf16.msra.mxu1 %v3138_v44 }
 0x301   : > { %3032 = vmatprep.subr.bf16.mxu1 %v3139_v13 }
 0x302   : > { %v1490_v49 = vmax.f32 %v1432_v47, 0.0  ;;  %v2787_v50 = vpop.f32.mrb[80].mxu0 }
 0x303   : > { %v2788_v51 = vpop.f32.mrb[81].mxu0 }
 0x304   : > { %v2789_v52 = vadd.f32 %v2788_v51, %v2787_v50  ;;  %v2790_v53 = vpop.f32.mrb[82].mxu0  ;;  %v1510_v54 = vpack.c.bf16 %v1490_v49, %v1489_v48  ;;  %3040 = vmatpush3.bf16.msra.mxu1 %v3139_v13 }
 0x305   : > { %v2791_v55 = vpop.f32.mrb[83].mxu0 }
 0x306   : > { %v1437_v56 = vadd.f32 %v2789_v52, %v3592_v25  ;;  %v2792_v57 = vadd.f32 %v2791_v55, %v2790_v53  ;;  %1766 = vmatmul.mubr.bf16.gmra.mrb[108].mxu1 %v1510_v54  ;;  %v3140_v53 = vld [vmem:[%s3903_s11 + $0x10] sm:$0xff]  }
 0x307   : > { %1775 = vmatprep.mubr.bf16.mxu1 %v3154_v2  ;;  %3033 = vmatprep.subr.bf16.mxu1 %v3140_v53 }
 0x308   : > { %v1440_v58 = vadd.f32 %v2792_v57, %v3592_v25  ;;  %v1491_v59 = vmax.f32 %v1437_v56, 0.0  ;;  %3041 = vmatpush3.bf16.msra.mxu1 %v3140_v53 }
 0x30a   : > { %v1492_v60 = vmax.f32 %v1440_v58, 0.0  ;;  %v2793_v61 = vpop.f32.mrb[84].mxu0 }
 0x30b   : > { %v2794_v62 = vpop.f32.mrb[85].mxu0 }
 0x30c   : > { %v2795_v63 = vadd.f32 %v2794_v62, %v2793_v61  ;;  %v2796_v0 = vpop.f32.mrb[86].mxu0  ;;  %v1511_v1 = vpack.c.bf16 %v1492_v60, %v1491_v59 }
 0x30d   : > { %v2797_v4 = vpop.f32.mrb[87].mxu0 }
 0x30e   : > { %v1445_v5 = vadd.f32 %v2795_v63, %v3592_v25  ;;  %v2798_v3 = vadd.f32 %v2797_v4, %v2796_v0  ;;  %1776 = vmatmul.mubr.bf16.gmra.mrb[112].mxu1 %v1511_v1 }
 0x30f   : > { %1785 = vmatprep.mubr.bf16.mxu1 %v3154_v2 }
 0x310   : > { %v1448_v6 = vadd.f32 %v2798_v3, %v3592_v25  ;;  %v1493_v7 = vmax.f32 %v1445_v5, 0.0 }
 0x312   : > { %v1494_v8 = vmax.f32 %v1448_v6, 0.0  ;;  %v2799_v9 = vpop.f32.mrb[88].mxu0 }
 0x313   : > { %v2800_v12 = vpop.f32.mrb[89].mxu0 }
 0x314   : > { %v2801_v14 = vadd.f32 %v2800_v12, %v2799_v9  ;;  %v2802_v15 = vpop.f32.mrb[90].mxu0  ;;  %v1512_v18 = vpack.c.bf16 %v1494_v8, %v1493_v7 }
 0x315   : > { %v2803_v19 = vpop.f32.mrb[91].mxu0 }
 0x316   : > { %v1453_v20 = vadd.f32 %v2801_v14, %v3592_v25  ;;  %v2804_v21 = vadd.f32 %v2803_v19, %v2802_v15  ;;  %1786 = vmatmul.mubr.bf16.gmra.mrb[116].mxu1 %v1512_v18 }
 0x317   : > { %1795 = vmatprep.mubr.bf16.mxu1 %v3154_v2 }
 0x318   : > { %v1456_v22 = vadd.f32 %v2804_v21, %v3592_v25  ;;  %v1495_v16 = vmax.f32 %v1453_v20, 0.0 }
 0x31a   : > { %v1496_v17 = vmax.f32 %v1456_v22, 0.0  ;;  %v2805_v23 = vpop.f32.mrb[92].mxu0 }
 0x31b   : > { %v2806_v24 = vpop.f32.mrb[93].mxu0 }
 0x31c   : > { %v2807_v26 = vadd.f32 %v2806_v24, %v2805_v23  ;;  %v2808_v27 = vpop.f32.mrb[94].mxu0  ;;  %v1513_v28 = vpack.c.bf16 %v1496_v17, %v1495_v16 }
 0x31d   : > { %v2809_v29 = vpop.f32.mrb[95].mxu0 }
 0x31e   : > { %v1461_v30 = vadd.f32 %v2807_v26, %v3592_v25  ;;  %v2810_v31 = vadd.f32 %v2809_v29, %v2808_v27  ;;  %1796 = vmatmul.mubr.bf16.gmra.mrb[120].mxu1 %v1513_v28 }
 0x31f   : > { %1805 = vmatprep.mubr.bf16.mxu1 %v3154_v2 }
 0x320   : > { %v1464_v32 = vadd.f32 %v2810_v31, %v3592_v25  ;;  %v1497_v33 = vmax.f32 %v1461_v30, 0.0 }
 0x322   : > { %v1498_v34 = vmax.f32 %v1464_v32, 0.0 }
 0x324   : > { %v1514_v35 = vpack.c.bf16 %v1498_v34, %v1497_v33 }
 0x326   : > { %1806 = vmatmul.mubr.bf16.gmra.mrb[124].mxu1 %v1514_v35 }
 0x381   : > { %v1657_v39 = vpop.f32.mrb[64].mxu1 }
 0x382   : > { %v1658_v2 = vadd.f32 %v1657_v39, %v3682_v37  ;;  %v1659_v25 = vpop.f32.mrb[65].mxu1 }
 0x383   : > { %v1660_v40 = vadd.f32 %v1659_v25, %v3686_v38  ;;  %v1661_v41 = vpop.f32.mrb[66].mxu1 }
 0x384   : > { %v1662_v42 = vadd.f32 %v1661_v41, %v3682_v37  ;;  %v1663_v43 = vpop.f32.mrb[67].mxu1  ;;  %v1816_v45 = vmax.f32 %v1658_v2, 0.0 }
 0x385   : > { %v1664_v11 = vadd.f32 %v1663_v43, %v3686_v38  ;;  %v1817_v46 = vmax.f32 %v1660_v40, 0.0 }
 0x386   : > { %v1818_v10 = vmax.f32 %v1662_v42, 0.0 }
 0x387   : > { %v1819_v47 = vmax.f32 %v1664_v11, 0.0 }
 0x388   : > { %v1880_v48 = vpack.c.bf16 %v1818_v10, %v1816_v45 }
 0x389   : > { %v1881_v49 = vpack.c.bf16 %v1819_v47, %v1817_v46  ;;  %v1667_v50 = vpop.f32.mrb[68].mxu1 }
 0x38a   : > { %v1668_v51 = vadd.f32 %v1667_v50, %v3682_v37  ;;  %v1669_v52 = vpop.f32.mrb[69].mxu1 }
 0x38b   : > { %v1670_v54 = vadd.f32 %v1669_v52, %v3686_v38  ;;  %v1671_v55 = vpop.f32.mrb[70].mxu1  ;;  %2079 = vmatprep.mubr.bf16.mxu0 %v1881_v49 }
 0x38c   : > { %v1672_v56 = vadd.f32 %v1671_v55, %v3682_v37  ;;  %v1673_v57 = vpop.f32.mrb[71].mxu1  ;;  %2080 = vmatmul.mubr.bf16.vlgmr.msra.gmra.mrb[96].mxu0 %v1880_v48  ;;  %v1820_v59 = vmax.f32 %v1668_v51, 0.0 }
 0x38d   : > { %v1674_v58 = vadd.f32 %v1673_v57, %v3686_v38  ;;  %2984 = vmatpush3.bf16.msra.mxu0 %v3138_v44  ;;  %v1821_v61 = vmax.f32 %v1670_v54, 0.0 }
 0x38e   : > { %v1822_v60 = vmax.f32 %v1672_v56, 0.0  ;;  %2985 = vmatprep.subr.bf16.mxu0 %v3139_v13 }
 0x38f   : > { %v1823_v62 = vmax.f32 %v1674_v58, 0.0 }
 0x390   : > { %v1882_v63 = vpack.c.bf16 %v1822_v60, %v1820_v59 }
 0x391   : > { %v1883_v0 = vpack.c.bf16 %v1823_v62, %v1821_v61  ;;  %v1677_v1 = vpop.f32.mrb[72].mxu1  ;;  %2986 = vmatpush3.bf16.msra.mxu0 %v3139_v13 }
 0x392   : > { %v1678_v4 = vadd.f32 %v1677_v1, %v3682_v37  ;;  %v1679_v5 = vpop.f32.mrb[73].mxu1  ;;  %2987 = vmatprep.subr.bf16.mxu0 %v3140_v53 }
 0x393   : > { %v1680_v3 = vadd.f32 %v1679_v5, %v3686_v38  ;;  %v1681_v6 = vpop.f32.mrb[74].mxu1  ;;  %2087 = vmatprep.mubr.bf16.mxu0 %v1883_v0 }
 0x394   : > { %v1682_v7 = vadd.f32 %v1681_v6, %v3682_v37  ;;  %v1683_v8 = vpop.f32.mrb[75].mxu1  ;;  %2088 = vmatmul.mubr.bf16.gmra.mrb[100].mxu0 %v1882_v63  ;;  %v1824_v12 = vmax.f32 %v1678_v4, 0.0 }
 0x395   : > { %v1684_v9 = vadd.f32 %v1683_v8, %v3686_v38  ;;  %2988 = vmatpush3.bf16.msra.mxu0 %v3140_v53  ;;  %v1825_v15 = vmax.f32 %v1680_v3, 0.0 }
 0x396   : > { %v1826_v14 = vmax.f32 %v1682_v7, 0.0 }
 0x397   : > { %v1827_v18 = vmax.f32 %v1684_v9, 0.0 }
 0x398   : > { %v1884_v19 = vpack.c.bf16 %v1826_v14, %v1824_v12 }
 0x399   : > { %v1885_v20 = vpack.c.bf16 %v1827_v18, %v1825_v15  ;;  %v1687_v21 = vpop.f32.mrb[76].mxu1 }
 0x39a   : > { %v1688_v22 = vadd.f32 %v1687_v21, %v3682_v37  ;;  %v1689_v16 = vpop.f32.mrb[77].mxu1 }
 0x39b   : > { %v1690_v17 = vadd.f32 %v1689_v16, %v3686_v38  ;;  %v1691_v23 = vpop.f32.mrb[78].mxu1  ;;  %2095 = vmatprep.mubr.bf16.mxu0 %v1885_v20 }
 0x39c   : > { %v1692_v24 = vadd.f32 %v1691_v23, %v3682_v37  ;;  %v1693_v26 = vpop.f32.mrb[79].mxu1  ;;  %2096 = vmatmul.mubr.bf16.gmra.mrb[104].mxu0 %v1884_v19  ;;  %v1828_v28 = vmax.f32 %v1688_v22, 0.0 }
 0x39d   : > { %v1694_v27 = vadd.f32 %v1693_v26, %v3686_v38  ;;  %v1829_v30 = vmax.f32 %v1690_v17, 0.0 }
 0x39e   : > { %v1830_v29 = vmax.f32 %v1692_v24, 0.0 }
 0x39f   : > { %v1831_v31 = vmax.f32 %v1694_v27, 0.0 }
 0x3a0   : > { %v1886_v32 = vpack.c.bf16 %v1830_v29, %v1828_v28 }
 0x3a1   : > { %v1887_v33 = vpack.c.bf16 %v1831_v31, %v1829_v30  ;;  %v1697_v34 = vpop.f32.mrb[80].mxu1 }
 0x3a2   : > { %v1698_v35 = vadd.f32 %v1697_v34, %v3682_v37  ;;  %v1699_v36 = vpop.f32.mrb[81].mxu1 }
 0x3a3   : > { %v1700_v39 = vadd.f32 %v1699_v36, %v3686_v38  ;;  %v1701_v2 = vpop.f32.mrb[82].mxu1  ;;  %2103 = vmatprep.mubr.bf16.mxu0 %v1887_v33 }
 0x3a4   : > { %v1702_v25 = vadd.f32 %v1701_v2, %v3682_v37  ;;  %v1703_v40 = vpop.f32.mrb[83].mxu1  ;;  %2104 = vmatmul.mubr.bf16.gmra.mrb[108].mxu0 %v1886_v32  ;;  %v1832_v42 = vmax.f32 %v1698_v35, 0.0 }
 0x3a5   : > { %v1704_v41 = vadd.f32 %v1703_v40, %v3686_v38  ;;  %v1833_v44 = vmax.f32 %v1700_v39, 0.0 }
 0x3a6   : > { %v1834_v43 = vmax.f32 %v1702_v25, 0.0 }
 0x3a7   : > { %v1835_v11 = vmax.f32 %v1704_v41, 0.0 }
 0x3a8   : > { %v1888_v45 = vpack.c.bf16 %v1834_v43, %v1832_v42 }
 0x3a9   : > { %v1889_v10 = vpack.c.bf16 %v1835_v11, %v1833_v44  ;;  %v1707_v13 = vpop.f32.mrb[84].mxu1 }
 0x3aa   : > { %v1708_v46 = vadd.f32 %v1707_v13, %v3682_v37  ;;  %v1709_v47 = vpop.f32.mrb[85].mxu1 }
 0x3ab   : > { %v1710_v48 = vadd.f32 %v1709_v47, %v3686_v38  ;;  %v1711_v49 = vpop.f32.mrb[86].mxu1  ;;  %2111 = vmatprep.mubr.bf16.mxu0 %v1889_v10 }
 0x3ac   : > { %v1712_v50 = vadd.f32 %v1711_v49, %v3682_v37  ;;  %v1713_v51 = vpop.f32.mrb[87].mxu1  ;;  %2112 = vmatmul.mubr.bf16.gmra.mrb[112].mxu0 %v1888_v45  ;;  %v1836_v53 = vmax.f32 %v1708_v46, 0.0 }
 0x3ad   : > { %v1714_v52 = vadd.f32 %v1713_v51, %v3686_v38  ;;  %v1837_v55 = vmax.f32 %v1710_v48, 0.0 }
 0x3ae   : > { %v1838_v54 = vmax.f32 %v1712_v50, 0.0 }
 0x3af   : > { %v1839_v56 = vmax.f32 %v1714_v52, 0.0 }
 0x3b0   : > { %v1890_v57 = vpack.c.bf16 %v1838_v54, %v1836_v53 }
 0x3b1   : > { %v1891_v58 = vpack.c.bf16 %v1839_v56, %v1837_v55  ;;  %v1717_v59 = vpop.f32.mrb[88].mxu1 }
 0x3b2   : > { %v1718_v60 = vadd.f32 %v1717_v59, %v3682_v37  ;;  %v1719_v61 = vpop.f32.mrb[89].mxu1 }
 0x3b3   : > { %v1720_v62 = vadd.f32 %v1719_v61, %v3686_v38  ;;  %v1721_v63 = vpop.f32.mrb[90].mxu1  ;;  %2119 = vmatprep.mubr.bf16.mxu0 %v1891_v58 }
 0x3b4   : > { %v1722_v0 = vadd.f32 %v1721_v63, %v3682_v37  ;;  %v1723_v1 = vpop.f32.mrb[91].mxu1  ;;  %2120 = vmatmul.mubr.bf16.gmra.mrb[116].mxu0 %v1890_v57  ;;  %v1840_v5 = vmax.f32 %v1718_v60, 0.0 }
 0x3b5   : > { %v1724_v4 = vadd.f32 %v1723_v1, %v3686_v38  ;;  %v1841_v6 = vmax.f32 %v1720_v62, 0.0 }
 0x3b6   : > { %v1842_v3 = vmax.f32 %v1722_v0, 0.0 }
 0x3b7   : > { %v1843_v7 = vmax.f32 %v1724_v4, 0.0 }
 0x3b8   : > { %v1892_v8 = vpack.c.bf16 %v1842_v3, %v1840_v5 }
 0x3b9   : > { %v1893_v9 = vpack.c.bf16 %v1843_v7, %v1841_v6  ;;  %v1727_v12 = vpop.f32.mrb[92].mxu1 }
 0x3ba   : > { %v1728_v14 = vadd.f32 %v1727_v12, %v3682_v37  ;;  %v1729_v15 = vpop.f32.mrb[93].mxu1 }
 0x3bb   : > { %v1730_v18 = vadd.f32 %v1729_v15, %v3686_v38  ;;  %v1731_v19 = vpop.f32.mrb[94].mxu1  ;;  %2127 = vmatprep.mubr.bf16.mxu0 %v1893_v9  ;;  %v3141_v15 = vld [vmem:[%s3903_s11 + $0x18] sm:$0xff]  }
 0x3bc   : > { %v1732_v20 = vadd.f32 %v1731_v19, %v3682_v37  ;;  %v1733_v21 = vpop.f32.mrb[95].mxu1  ;;  %2128 = vmatmul.mubr.bf16.gmra.mrb[120].mxu0 %v1892_v8  ;;  %v1844_v16 = vmax.f32 %v1728_v14, 0.0  ;;  %2989 = vmatprep.subr.bf16.mxu0 %v3141_v15 }
 0x3bd   : > { %v1734_v22 = vadd.f32 %v1733_v21, %v3686_v38  ;;  %v1845_v23 = vmax.f32 %v1730_v18, 0.0  ;;  %3034 = vmatprep.subr.bf16.mxu1 %v3141_v15  ;;  %2990 = vmatpush3.bf16.msra.mxu0 %v3141_v15 }
 0x3be   : > { %v1846_v17 = vmax.f32 %v1732_v20, 0.0  ;;  %3042 = vmatpush3.bf16.msra.mxu1 %v3141_v15 }
 0x3bf   : > { %v1847_v24 = vmax.f32 %v1734_v22, 0.0 }
 0x3c0   : > { %v1894_v26 = vpack.c.bf16 %v1846_v17, %v1844_v16 }
 0x3c1   : > { %v1895_v27 = vpack.c.bf16 %v1847_v24, %v1845_v23  ;;  %v1737_v28 = vpop.f32.mrb[96].mxu1  ;;  %v3142_v23 = vld [vmem:[%s3903_s11 + $0x20] sm:$0xff]  }
 0x3c2   : > { %v1738_v29 = vadd.f32 %v1737_v28, %v3682_v37  ;;  %v1739_v30 = vpop.f32.mrb[97].mxu1  ;;  %2991 = vmatprep.subr.bf16.mxu0 %v3142_v23  ;;  %3035 = vmatprep.subr.bf16.mxu1 %v3142_v23 }
 0x3c3   : > { %v1740_v31 = vadd.f32 %v1739_v30, %v3686_v38  ;;  %v1741_v32 = vpop.f32.mrb[98].mxu1  ;;  %2135 = vmatprep.mubr.bf16.mxu0 %v1895_v27  ;;  %2992 = vmatpush3.bf16.msra.mxu0 %v3142_v23 }
 0x3c4   : > { %v1742_v33 = vadd.f32 %v1741_v32, %v3682_v37  ;;  %v1743_v34 = vpop.f32.mrb[99].mxu1  ;;  %2136 = vmatmul.mubr.bf16.gmra.mrb[124].mxu0 %v1894_v26  ;;  %v1848_v36 = vmax.f32 %v1738_v29, 0.0  ;;  %v3143_v32 = vld [vmem:[%s3903_s11 + $0x28] sm:$0xff]   ;;  %3043 = vmatpush3.bf16.msra.mxu1 %v3142_v23 }
 0x3c5   : > { %v1744_v35 = vadd.f32 %v1743_v34, %v3686_v38  ;;  %v1849_v2 = vmax.f32 %v1740_v31, 0.0  ;;  %2993 = vmatprep.subr.bf16.mxu0 %v3143_v32  ;;  %3036 = vmatprep.subr.bf16.mxu1 %v3143_v32 }
 0x3c6   : > { %v1850_v39 = vmax.f32 %v1742_v33, 0.0 }
 0x3c7   : > { %v1851_v25 = vmax.f32 %v1744_v35, 0.0  ;;  %2994 = vmatpush3.bf16.msra.mxu0 %v3143_v32 }
 0x3c8   : > { %v1896_v40 = vpack.c.bf16 %v1850_v39, %v1848_v36  ;;  %3044 = vmatpush3.bf16.msra.mxu1 %v3143_v32 }
 0x3c9   : > { %v1897_v41 = vpack.c.bf16 %v1851_v25, %v1849_v2  ;;  %v1747_v42 = vpop.f32.mrb[100].mxu1 }
 0x3ca   : > { %v1748_v43 = vadd.f32 %v1747_v42, %v3682_v37  ;;  %v1749_v44 = vpop.f32.mrb[101].mxu1 }
 0x3cb   : > { %v1750_v11 = vadd.f32 %v1749_v44, %v3686_v38  ;;  %v1751_v45 = vpop.f32.mrb[102].mxu1  ;;  %2143 = vmatprep.mubr.bf16.mxu0 %v1897_v41 }
 0x3cc   : > { %v1752_v10 = vadd.f32 %v1751_v45, %v3682_v37  ;;  %v1753_v13 = vpop.f32.mrb[103].mxu1  ;;  %2144 = vmatmul.mubr.bf16.gmra.mrb[128].mxu0 %v1896_v40  ;;  %v1852_v47 = vmax.f32 %v1748_v43, 0.0  ;;  %v3144_v40 = vld [vmem:[%s3903_s11 + $0x30] sm:$0xff]  }
 0x3cd   : > { %v1754_v46 = vadd.f32 %v1753_v13, %v3686_v38  ;;  %v1853_v49 = vmax.f32 %v1750_v11, 0.0  ;;  %2995 = vmatprep.subr.bf16.mxu0 %v3144_v40  ;;  %3037 = vmatprep.subr.bf16.mxu1 %v3144_v40  ;;  %v3145_v13 = vld [vmem:[%s3903_s11 + $0x38] sm:$0xff]  }
 0x3ce   : > { %v1854_v48 = vmax.f32 %v1752_v10, 0.0  ;;  %2996 = vmatpush3.bf16.msra.mxu0 %v3144_v40  ;;  %3045 = vmatpush3.bf16.msra.mxu1 %v3144_v40 }
 0x3cf   : > { %v1855_v50 = vmax.f32 %v1754_v46, 0.0  ;;  %2997 = vmatprep.subr.bf16.mxu0 %v3145_v13  ;;  %3038 = vmatprep.subr.bf16.mxu1 %v3145_v13 }
 0x3d0   : > { %v1898_v51 = vpack.c.bf16 %v1854_v48, %v1852_v47 }
 0x3d1   : > { %v1899_v52 = vpack.c.bf16 %v1855_v50, %v1853_v49  ;;  %v1757_v53 = vpop.f32.mrb[104].mxu1 }
 0x3d2   : > { %v1758_v54 = vadd.f32 %v1757_v53, %v3682_v37  ;;  %v1759_v55 = vpop.f32.mrb[105].mxu1  ;;  %2998 = vmatpush3.bf16.msra.mxu0 %v3145_v13  ;;  %3046 = vmatpush3.bf16.msra.mxu1 %v3145_v13 }
 0x3d3   : > { %v1760_v56 = vadd.f32 %v1759_v55, %v3686_v38  ;;  %v1761_v57 = vpop.f32.mrb[106].mxu1  ;;  %2151 = vmatprep.mubr.bf16.mxu0 %v1899_v52 }
 0x3d4   : > { %v1762_v58 = vadd.f32 %v1761_v57, %v3682_v37  ;;  %v1763_v59 = vpop.f32.mrb[107].mxu1  ;;  %2152 = vmatmul.mubr.bf16.gmra.mrb[132].mxu0 %v1898_v51  ;;  %v1856_v61 = vmax.f32 %v1758_v54, 0.0 }
 0x3d5   : > { %v1764_v60 = vadd.f32 %v1763_v59, %v3686_v38  ;;  %v1857_v63 = vmax.f32 %v1760_v56, 0.0 }
 0x3d6   : > { %v1858_v62 = vmax.f32 %v1762_v58, 0.0 }
 0x3d7   : > { %v1859_v0 = vmax.f32 %v1764_v60, 0.0 }
 0x3d8   : > { %v1900_v1 = vpack.c.bf16 %v1858_v62, %v1856_v61 }
 0x3d9   : > { %v1901_v4 = vpack.c.bf16 %v1859_v0, %v1857_v63  ;;  %v1767_v5 = vpop.f32.mrb[108].mxu1 }
 0x3da   : > { %v1768_v3 = vadd.f32 %v1767_v5, %v3682_v37  ;;  %v1769_v6 = vpop.f32.mrb[109].mxu1 }
 0x3db   : > { %v1770_v7 = vadd.f32 %v1769_v6, %v3686_v38  ;;  %v1771_v8 = vpop.f32.mrb[110].mxu1  ;;  %2159 = vmatprep.mubr.bf16.mxu0 %v1901_v4 }
 0x3dc   : > { %v1772_v9 = vadd.f32 %v1771_v8, %v3682_v37  ;;  %v1773_v12 = vpop.f32.mrb[111].mxu1  ;;  %2160 = vmatmul.mubr.bf16.gmra.mrb[136].mxu0 %v1900_v1  ;;  %v1860_v18 = vmax.f32 %v1768_v3, 0.0 }
 0x3dd   : > { %v1774_v14 = vadd.f32 %v1773_v12, %v3686_v38  ;;  %v1861_v20 = vmax.f32 %v1770_v7, 0.0 }
 0x3de   : > { %v1862_v19 = vmax.f32 %v1772_v9, 0.0 }
 0x3df   : > { %v1863_v21 = vmax.f32 %v1774_v14, 0.0 }
 0x3e0   : > { %v1902_v22 = vpack.c.bf16 %v1862_v19, %v1860_v18 }
 0x3e1   : > { %v1903_v16 = vpack.c.bf16 %v1863_v21, %v1861_v20  ;;  %v1777_v17 = vpop.f32.mrb[112].mxu1 }
 0x3e2   : > { %v1778_v24 = vadd.f32 %v1777_v17, %v3682_v37  ;;  %v1779_v26 = vpop.f32.mrb[113].mxu1 }
 0x3e3   : > { %v1780_v27 = vadd.f32 %v1779_v26, %v3686_v38  ;;  %v1781_v28 = vpop.f32.mrb[114].mxu1  ;;  %2167 = vmatprep.mubr.bf16.mxu0 %v1903_v16  ;;  %v3779_v16 = vld [vmem:[%s3902_s10] ss:$0 sm:$0xff] }
 0x3e4   : > { %v1782_v29 = vadd.f32 %v1781_v28, %v3682_v37  ;;  %v1783_v30 = vpop.f32.mrb[115].mxu1  ;;  %2168 = vmatmul.mubr.bf16.gmra.mrb[140].mxu0 %v1902_v22  ;;  %v1864_v33 = vmax.f32 %v1778_v24, 0.0 }
 0x3e5   : > { %v1784_v31 = vadd.f32 %v1783_v30, %v3686_v38  ;;  %v1865_v35 = vmax.f32 %v1780_v27, 0.0 }
 0x3e6   : > { %v1866_v34 = vmax.f32 %v1782_v29, 0.0 }
 0x3e7   : > { %v1867_v36 = vmax.f32 %v1784_v31, 0.0 }
 0x3e8   : > { %v1904_v39 = vpack.c.bf16 %v1866_v34, %v1864_v33 }
 0x3e9   : > { %v1905_v2 = vpack.c.bf16 %v1867_v36, %v1865_v35  ;;  %v1787_v25 = vpop.f32.mrb[116].mxu1 }
 0x3ea   : > { %v1788_v41 = vadd.f32 %v1787_v25, %v3682_v37  ;;  %v1789_v42 = vpop.f32.mrb[117].mxu1 }
 0x3eb   : > { %v1790_v43 = vadd.f32 %v1789_v42, %v3686_v38  ;;  %v1791_v44 = vpop.f32.mrb[118].mxu1  ;;  %2175 = vmatprep.mubr.bf16.mxu0 %v1905_v2 }
 0x3ec   : > { %v1792_v11 = vadd.f32 %v1791_v44, %v3682_v37  ;;  %v1793_v45 = vpop.f32.mrb[119].mxu1  ;;  %2176 = vmatmul.mubr.bf16.gmra.mrb[144].mxu0 %v1904_v39  ;;  %v1868_v46 = vmax.f32 %v1788_v41, 0.0 }
 0x3ed   : > { %v1794_v10 = vadd.f32 %v1793_v45, %v3686_v38  ;;  %v1869_v48 = vmax.f32 %v1790_v43, 0.0 }
 0x3ee   : > { %v1870_v47 = vmax.f32 %v1792_v11, 0.0 }
 0x3ef   : > { %v1871_v49 = vmax.f32 %v1794_v10, 0.0 }
 0x3f0   : > { %v1906_v50 = vpack.c.bf16 %v1870_v47, %v1868_v46 }
 0x3f1   : > { %v1907_v51 = vpack.c.bf16 %v1871_v49, %v1869_v48  ;;  %v1797_v52 = vpop.f32.mrb[120].mxu1 }
 0x3f2   : > { %v1798_v53 = vadd.f32 %v1797_v52, %v3682_v37  ;;  %v1799_v54 = vpop.f32.mrb[121].mxu1 }
 0x3f3   : > { %v1800_v55 = vadd.f32 %v1799_v54, %v3686_v38  ;;  %v1801_v56 = vpop.f32.mrb[122].mxu1  ;;  %2183 = vmatprep.mubr.bf16.mxu0 %v1907_v51 }
 0x3f4   : > { %v1802_v57 = vadd.f32 %v1801_v56, %v3682_v37  ;;  %v1803_v58 = vpop.f32.mrb[123].mxu1  ;;  %2184 = vmatmul.mubr.bf16.gmra.mrb[148].mxu0 %v1906_v50  ;;  %v1872_v60 = vmax.f32 %v1798_v53, 0.0 }
 0x3f5   : > { %v1804_v59 = vadd.f32 %v1803_v58, %v3686_v38  ;;  %v1873_v62 = vmax.f32 %v1800_v55, 0.0 }
 0x3f6   : > { %v1874_v61 = vmax.f32 %v1802_v57, 0.0 }
 0x3f7   : > { %v1875_v63 = vmax.f32 %v1804_v59, 0.0 }
 0x3f8   : > { %v1908_v0 = vpack.c.bf16 %v1874_v61, %v1872_v60 }
 0x3f9   : > { %v1909_v1 = vpack.c.bf16 %v1875_v63, %v1873_v62  ;;  %v1807_v4 = vpop.f32.mrb[124].mxu1 }
 0x3fa   : > { %v1808_v5 = vadd.f32 %v1807_v4, %v3682_v37  ;;  %v1809_v3 = vpop.f32.mrb[125].mxu1 }
 0x3fb   : > { %v1810_v6 = vadd.f32 %v1809_v3, %v3686_v38  ;;  %v1811_v7 = vpop.f32.mrb[126].mxu1  ;;  %2191 = vmatprep.mubr.bf16.mxu0 %v1909_v1 }
 0x3fc   : > { %v1812_v8 = vadd.f32 %v1811_v7, %v3682_v37  ;;  %v1813_v9 = vpop.f32.mrb[127].mxu1  ;;  %2192 = vmatmul.mubr.bf16.gmra.mrb[152].mxu0 %v1908_v0  ;;  %v1876_v14 = vmax.f32 %v1808_v5, 0.0 }
 0x3fd   : > { %v1814_v12 = vadd.f32 %v1813_v9, %v3686_v38  ;;  %v1877_v18 = vmax.f32 %v1810_v6, 0.0 }
 0x3fe   : > { %v1878_v15 = vmax.f32 %v1812_v8, 0.0 }
 0x3ff   : > { %v1879_v19 = vmax.f32 %v1814_v12, 0.0 }
 0x400   : > { %v1910_v20 = vpack.c.bf16 %v1878_v15, %v1876_v14 }
 0x401   : > { %v1911_v21 = vpack.c.bf16 %v1879_v19, %v1877_v18 }
 0x403   : > { %2199 = vmatprep.mubr.bf16.mxu0 %v1911_v21 }
 0x404   : > { %2200 = vmatmul.mubr.bf16.gmra.mrb[156].mxu0 %v1910_v20 }
 0x45f   : > { %v2827_v22 = vpop.f32.mrb[96].mxu0 }
 0x460   : > { %v2828_v17 = vpop.f32.mrb[97].mxu0 }
 0x461   : > { %v2829_v37 = vadd.f32 %v2828_v17, %v2827_v22  ;;  %v2830_v23 = vpop.f32.mrb[98].mxu0 }
 0x462   : > { %v2831_v24 = vpop.f32.mrb[99].mxu0 }
 0x463   : > { %v2082_v38 = vadd.f32 %v2829_v37, %v3779_v16  ;;  %v2832_v26 = vadd.f32 %v2831_v24, %v2830_v23 }
 0x465   : > { %v2085_v27 = vadd.f32 %v2832_v26, %v3779_v16  ;;  %v2208_v28 = vmax.f32 %v2082_v38, 0.0 }
 0x467   : > { %v2209_v29 = vmax.f32 %v2085_v27, 0.0  ;;  %v2833_v30 = vpop.f32.mrb[100].mxu0 }
 0x468   : > { %v2834_v31 = vpop.f32.mrb[101].mxu0 }
 0x469   : > { %v2835_v32 = vadd.f32 %v2834_v31, %v2833_v30  ;;  %v2836_v33 = vpop.f32.mrb[102].mxu0  ;;  %v2240_v34 = vpack.c.bf16 %v2209_v29, %v2208_v28 }
 0x46a   : > { %v2837_v35 = vpop.f32.mrb[103].mxu0 }
 0x46b   : > { %v2090_v36 = vadd.f32 %v2835_v32, %v3779_v16  ;;  %v2838_v39 = vadd.f32 %v2837_v35, %v2836_v33  ;;  %2999 = vmatprep.mubr.bf16.mxu0 %v2240_v34 }
 0x46d   : > { %v2093_v2 = vadd.f32 %v2838_v39, %v3779_v16  ;;  %v2210_v25 = vmax.f32 %v2090_v36, 0.0 }
 0x46f   : > { %v2211_v40 = vmax.f32 %v2093_v2, 0.0  ;;  %v2839_v41 = vpop.f32.mrb[104].mxu0 }
 0x470   : > { %v2840_v42 = vpop.f32.mrb[105].mxu0 }
 0x471   : > { %v2241_v43 = vpack.c.bf16 %v2211_v40, %v2210_v25  ;;  %v2841_v44 = vadd.f32 %v2840_v42, %v2839_v41  ;;  %v2842_v11 = vpop.f32.mrb[106].mxu0 }
 0x472   : > { %v2843_v45 = vpop.f32.mrb[107].mxu0 }
 0x473   : > { %v2098_v10 = vadd.f32 %v2841_v44, %v3779_v16  ;;  %v2844_v13 = vadd.f32 %v2843_v45, %v2842_v11  ;;  %3000 = vmatmul.mubr.bf16.vlgmr.msra.gmra.mrb[160].mxu0 %v2241_v43 }
 0x475   : > { %v2101_v46 = vadd.f32 %v2844_v13, %v3779_v16  ;;  %v2212_v47 = vmax.f32 %v2098_v10, 0.0 }
 0x477   : > { %v2213_v48 = vmax.f32 %v2101_v46, 0.0  ;;  %v2845_v49 = vpop.f32.mrb[108].mxu0 }
 0x478   : > { %v2846_v50 = vpop.f32.mrb[109].mxu0 }
 0x479   : > { %v2847_v51 = vadd.f32 %v2846_v50, %v2845_v49  ;;  %v2848_v52 = vpop.f32.mrb[110].mxu0  ;;  %v2242_v53 = vpack.c.bf16 %v2213_v48, %v2212_v47 }
 0x47a   : > { %v2849_v54 = vpop.f32.mrb[111].mxu0 }
 0x47b   : > { %v2106_v55 = vadd.f32 %v2847_v51, %v3779_v16  ;;  %v2850_v56 = vadd.f32 %v2849_v54, %v2848_v52  ;;  %3003 = vmatprep.mubr.bf16.mxu1 %v2242_v53 }
 0x47d   : > { %v2109_v57 = vadd.f32 %v2850_v56, %v3779_v16  ;;  %v2214_v58 = vmax.f32 %v2106_v55, 0.0 }
 0x47f   : > { %v2215_v59 = vmax.f32 %v2109_v57, 0.0  ;;  %v2851_v60 = vpop.f32.mrb[112].mxu0 }
 0x480   : > { %v2852_v61 = vpop.f32.mrb[113].mxu0 }
 0x481   : > { %v2243_v62 = vpack.c.bf16 %v2215_v59, %v2214_v58  ;;  %v2853_v63 = vadd.f32 %v2852_v61, %v2851_v60  ;;  %v2854_v0 = vpop.f32.mrb[114].mxu0 }
 0x482   : > { %v2855_v1 = vpop.f32.mrb[115].mxu0 }
 0x483   : > { %v2114_v4 = vadd.f32 %v2853_v63, %v3779_v16  ;;  %v2856_v5 = vadd.f32 %v2855_v1, %v2854_v0  ;;  %3004 = vmatmul.mubr.bf16.vlgmr.msra.gmra.mrb[128].mxu1 %v2243_v62 }
 0x485   : > { %v2117_v3 = vadd.f32 %v2856_v5, %v3779_v16  ;;  %v2216_v6 = vmax.f32 %v2114_v4, 0.0 }
 0x487   : > { %v2217_v7 = vmax.f32 %v2117_v3, 0.0  ;;  %v2857_v8 = vpop.f32.mrb[116].mxu0 }
 0x488   : > { %v2858_v9 = vpop.f32.mrb[117].mxu0 }
 0x489   : > { %v2859_v12 = vadd.f32 %v2858_v9, %v2857_v8  ;;  %v2860_v14 = vpop.f32.mrb[118].mxu0  ;;  %v2244_v15 = vpack.c.bf16 %v2217_v7, %v2216_v6 }
 0x48a   : > { %v2861_v18 = vpop.f32.mrb[119].mxu0 }
 0x48b   : > { %v2122_v19 = vadd.f32 %v2859_v12, %v3779_v16  ;;  %v2862_v20 = vadd.f32 %v2861_v18, %v2860_v14  ;;  %3007 = vmatprep.mubr.bf16.mxu1 %v2244_v15 }
 0x48d   : > { %v2125_v21 = vadd.f32 %v2862_v20, %v3779_v16  ;;  %v2218_v22 = vmax.f32 %v2122_v19, 0.0 }
 0x48f   : > { %v2219_v17 = vmax.f32 %v2125_v21, 0.0  ;;  %v2863_v37 = vpop.f32.mrb[120].mxu0 }
 0x490   : > { %v2864_v23 = vpop.f32.mrb[121].mxu0 }
 0x491   : > { %v2865_v24 = vadd.f32 %v2864_v23, %v2863_v37  ;;  %v2866_v38 = vpop.f32.mrb[122].mxu0  ;;  %v2245_v26 = vpack.c.bf16 %v2219_v17, %v2218_v22 }
 0x492   : > { %v2867_v27 = vpop.f32.mrb[123].mxu0 }
 0x493   : > { %v2130_v28 = vadd.f32 %v2865_v24, %v3779_v16  ;;  %v2868_v29 = vadd.f32 %v2867_v27, %v2866_v38  ;;  %3008 = vmatmul.mubr.bf16.gmra.mrb[132].mxu1 %v2245_v26 }
 0x495   : > { %v2133_v30 = vadd.f32 %v2868_v29, %v3779_v16  ;;  %v2220_v31 = vmax.f32 %v2130_v28, 0.0 }
 0x497   : > { %v2221_v32 = vmax.f32 %v2133_v30, 0.0  ;;  %v2869_v33 = vpop.f32.mrb[124].mxu0 }
 0x498   : > { %v2870_v34 = vpop.f32.mrb[125].mxu0 }
 0x499   : > { %v2871_v35 = vadd.f32 %v2870_v34, %v2869_v33  ;;  %v2872_v36 = vpop.f32.mrb[126].mxu0  ;;  %v2246_v39 = vpack.c.bf16 %v2221_v32, %v2220_v31 }
 0x49a   : > { %v2873_v2 = vpop.f32.mrb[127].mxu0 }
 0x49b   : > { %v2138_v25 = vadd.f32 %v2871_v35, %v3779_v16  ;;  %v2874_v40 = vadd.f32 %v2873_v2, %v2872_v36  ;;  %3011 = vmatprep.mubr.bf16.mxu1 %v2246_v39 }
 0x49d   : > { %v2141_v41 = vadd.f32 %v2874_v40, %v3779_v16  ;;  %v2222_v42 = vmax.f32 %v2138_v25, 0.0 }
 0x49f   : > { %v2223_v43 = vmax.f32 %v2141_v41, 0.0  ;;  %v2875_v44 = vpop.f32.mrb[128].mxu0 }
 0x4a0   : > { %v2876_v11 = vpop.f32.mrb[129].mxu0 }
 0x4a1   : > { %v2877_v45 = vadd.f32 %v2876_v11, %v2875_v44  ;;  %v2878_v10 = vpop.f32.mrb[130].mxu0  ;;  %v2247_v13 = vpack.c.bf16 %v2223_v43, %v2222_v42 }
 0x4a2   : > { %v2879_v46 = vpop.f32.mrb[131].mxu0 }
 0x4a3   : > { %v2146_v47 = vadd.f32 %v2877_v45, %v3779_v16  ;;  %v2880_v48 = vadd.f32 %v2879_v46, %v2878_v10  ;;  %3012 = vmatmul.mubr.bf16.gmra.mrb[136].mxu1 %v2247_v13 }
 0x4a5   : > { %v2149_v49 = vadd.f32 %v2880_v48, %v3779_v16  ;;  %v2224_v50 = vmax.f32 %v2146_v47, 0.0 }
 0x4a7   : > { %v2225_v51 = vmax.f32 %v2149_v49, 0.0  ;;  %v2881_v52 = vpop.f32.mrb[132].mxu0 }
 0x4a8   : > { %v2882_v53 = vpop.f32.mrb[133].mxu0 }
 0x4a9   : > { %v2883_v54 = vadd.f32 %v2882_v53, %v2881_v52  ;;  %v2884_v55 = vpop.f32.mrb[134].mxu0  ;;  %v2248_v56 = vpack.c.bf16 %v2225_v51, %v2224_v50 }
 0x4aa   : > { %v2885_v57 = vpop.f32.mrb[135].mxu0 }
 0x4ab   : > { %v2154_v58 = vadd.f32 %v2883_v54, %v3779_v16  ;;  %v2886_v59 = vadd.f32 %v2885_v57, %v2884_v55  ;;  %3015 = vmatprep.mubr.bf16.mxu1 %v2248_v56 }
 0x4ad   : > { %v2157_v60 = vadd.f32 %v2886_v59, %v3779_v16  ;;  %v2226_v61 = vmax.f32 %v2154_v58, 0.0 }
 0x4af   : > { %v2227_v62 = vmax.f32 %v2157_v60, 0.0  ;;  %v2887_v63 = vpop.f32.mrb[136].mxu0 }
 0x4b0   : > { %v2888_v0 = vpop.f32.mrb[137].mxu0 }
 0x4b1   : > { %v2889_v1 = vadd.f32 %v2888_v0, %v2887_v63  ;;  %v2890_v4 = vpop.f32.mrb[138].mxu0  ;;  %v2249_v5 = vpack.c.bf16 %v2227_v62, %v2226_v61 }
 0x4b2   : > { %v2891_v3 = vpop.f32.mrb[139].mxu0 }
 0x4b3   : > { %v2162_v6 = vadd.f32 %v2889_v1, %v3779_v16  ;;  %v2892_v7 = vadd.f32 %v2891_v3, %v2890_v4  ;;  %3016 = vmatmul.mubr.bf16.gmra.mrb[140].mxu1 %v2249_v5  ;;  %v3816_v5 = vld [vmem:[%s3904_s12] ss:$0 sm:$0xff] }
 0x4b5   : > { %v2165_v8 = vadd.f32 %v2892_v7, %v3779_v16  ;;  %v2228_v9 = vmax.f32 %v2162_v6, 0.0 }
 0x4b7   : > { %v2229_v12 = vmax.f32 %v2165_v8, 0.0  ;;  %v2893_v14 = vpop.f32.mrb[140].mxu0 }
 0x4b8   : > { %v2894_v15 = vpop.f32.mrb[141].mxu0 }
 0x4b9   : > { %v2895_v18 = vadd.f32 %v2894_v15, %v2893_v14  ;;  %v2896_v19 = vpop.f32.mrb[142].mxu0  ;;  %v2250_v20 = vpack.c.bf16 %v2229_v12, %v2228_v9 }
 0x4ba   : > { %v2897_v21 = vpop.f32.mrb[143].mxu0 }
 0x4bb   : > { %v2170_v22 = vadd.f32 %v2895_v18, %v3779_v16  ;;  %v2898_v17 = vadd.f32 %v2897_v21, %v2896_v19  ;;  %3019 = vmatprep.mubr.bf16.mxu1 %v2250_v20 }
 0x4bd   : > { %v2173_v37 = vadd.f32 %v2898_v17, %v3779_v16  ;;  %v2230_v23 = vmax.f32 %v2170_v22, 0.0 }
 0x4bf   : > { %v2231_v24 = vmax.f32 %v2173_v37, 0.0  ;;  %v2899_v38 = vpop.f32.mrb[144].mxu0 }
 0x4c0   : > { %v2900_v26 = vpop.f32.mrb[145].mxu0 }
 0x4c1   : > { %v2901_v27 = vadd.f32 %v2900_v26, %v2899_v38  ;;  %v2902_v28 = vpop.f32.mrb[146].mxu0  ;;  %v2251_v29 = vpack.c.bf16 %v2231_v24, %v2230_v23 }
 0x4c2   : > { %v2903_v30 = vpop.f32.mrb[147].mxu0 }
 0x4c3   : > { %v2178_v31 = vadd.f32 %v2901_v27, %v3779_v16  ;;  %v2904_v32 = vadd.f32 %v2903_v30, %v2902_v28  ;;  %3020 = vmatmul.mubr.bf16.gmra.mrb[144].mxu1 %v2251_v29 }
 0x4c5   : > { %v2181_v33 = vadd.f32 %v2904_v32, %v3779_v16  ;;  %v2232_v34 = vmax.f32 %v2178_v31, 0.0 }
 0x4c7   : > { %v2233_v35 = vmax.f32 %v2181_v33, 0.0  ;;  %v2905_v36 = vpop.f32.mrb[148].mxu0 }
 0x4c8   : > { %v2906_v39 = vpop.f32.mrb[149].mxu0 }
 0x4c9   : > { %v2907_v2 = vadd.f32 %v2906_v39, %v2905_v36  ;;  %v2908_v25 = vpop.f32.mrb[150].mxu0  ;;  %v2252_v40 = vpack.c.bf16 %v2233_v35, %v2232_v34 }
 0x4ca   : > { %v2909_v41 = vpop.f32.mrb[151].mxu0 }
 0x4cb   : > { %v2186_v42 = vadd.f32 %v2907_v2, %v3779_v16  ;;  %v2910_v43 = vadd.f32 %v2909_v41, %v2908_v25  ;;  %3023 = vmatprep.mubr.bf16.mxu1 %v2252_v40 }
 0x4cd   : > { %v2189_v44 = vadd.f32 %v2910_v43, %v3779_v16  ;;  %v2234_v11 = vmax.f32 %v2186_v42, 0.0 }
 0x4cf   : > { %v2235_v45 = vmax.f32 %v2189_v44, 0.0  ;;  %v2911_v10 = vpop.f32.mrb[152].mxu0 }
 0x4d0   : > { %v2912_v13 = vpop.f32.mrb[153].mxu0 }
 0x4d1   : > { %v2913_v46 = vadd.f32 %v2912_v13, %v2911_v10  ;;  %v2914_v47 = vpop.f32.mrb[154].mxu0  ;;  %v2253_v48 = vpack.c.bf16 %v2235_v45, %v2234_v11 }
 0x4d2   : > { %v2915_v49 = vpop.f32.mrb[155].mxu0 }
 0x4d3   : > { %v2194_v50 = vadd.f32 %v2913_v46, %v3779_v16  ;;  %v2916_v51 = vadd.f32 %v2915_v49, %v2914_v47  ;;  %3024 = vmatmul.mubr.bf16.gmra.mrb[148].mxu1 %v2253_v48 }
 0x4d5   : > { %v2197_v52 = vadd.f32 %v2916_v51, %v3779_v16  ;;  %v2236_v53 = vmax.f32 %v2194_v50, 0.0 }
 0x4d7   : > { %v2237_v54 = vmax.f32 %v2197_v52, 0.0  ;;  %v2917_v55 = vpop.f32.mrb[156].mxu0 }
 0x4d8   : > { %v2918_v56 = vpop.f32.mrb[157].mxu0 }
 0x4d9   : > { %v2919_v57 = vadd.f32 %v2918_v56, %v2917_v55  ;;  %v2920_v58 = vpop.f32.mrb[158].mxu0  ;;  %v2254_v59 = vpack.c.bf16 %v2237_v54, %v2236_v53 }
 0x4da   : > { %v2921_v60 = vpop.f32.mrb[159].mxu0 }
 0x4db   : > { %v2202_v61 = vadd.f32 %v2919_v57, %v3779_v16  ;;  %v2922_v62 = vadd.f32 %v2921_v60, %v2920_v58  ;;  %3027 = vmatprep.mubr.bf16.mxu1 %v2254_v59 }
 0x4dd   : > { %v2205_v63 = vadd.f32 %v2922_v62, %v3779_v16  ;;  %v2238_v0 = vmax.f32 %v2202_v61, 0.0 }
 0x4df   : > { %v2239_v1 = vmax.f32 %v2205_v63, 0.0 }
 0x4e1   : > { %v2255_v4 = vpack.c.bf16 %v2239_v1, %v2238_v0 }
 0x4e3   : > { %3028 = vmatmul.mubr.bf16.gmra.mrb[152].mxu1 %v2255_v4 }
 0x546   : > { %v3001_v16 = vpop.f32.mrb[160].mxu0 }
 0x547   : > { %v2370_v3 = vadd.f32 %v3001_v16, %v3816_v5  ;;  %v2361_v6 = vpop.f32.mrb[161].mxu0 }
 0x548   : > { %v2362_v7 = vadd.f32 %v3816_v5, %v2361_v6  ;;  %v3002_v8 = vpop.f32.mrb[162].mxu0 }
 0x549   : > { %2490 = vst [vmem:[%s3823_s27 + $0x10] sm:$0xff] %v2370_v3  ;;  %v2373_v9 = vadd.f32 %v3002_v8, %v3816_v5  ;;  %v2364_v12 = vpop.f32.mrb[163].mxu0 }
 0x54a   : > { %2488 = vst [vmem:[%s3823_s27] sm:$0xff] %v2362_v7  ;;  %v2365_v14 = vadd.f32 %v3816_v5, %v2364_v12 }
 0x54b   : > { %2491 = vst [vmem:[%s3823_s27 + $0x18] sm:$0xff] %v2373_v9 }
 0x54c   : > { %2489 = vst [vmem:[%s3823_s27 + $0x8] sm:$0xff] %v2365_v14 }
 0x556   : > { %v3005_v15 = vpop.f32.mrb[128].mxu1 }
 0x557   : > { %v2386_v18 = vadd.f32 %v3005_v15, %v3816_v5  ;;  %v2377_v19 = vpop.f32.mrb[129].mxu1 }
 0x558   : > { %v2378_v20 = vadd.f32 %v3816_v5, %v2377_v19  ;;  %v3006_v21 = vpop.f32.mrb[130].mxu1 }
 0x559   : > { %2494 = vst [vmem:[%s3823_s27 + $0x30] sm:$0xff] %v2386_v18  ;;  %v2389_v22 = vadd.f32 %v3006_v21, %v3816_v5  ;;  %v2380_v17 = vpop.f32.mrb[131].mxu1 }
 0x55a   : > { %2492 = vst [vmem:[%s3823_s27 + $0x20] sm:$0xff] %v2378_v20  ;;  %v2381_v37 = vadd.f32 %v3816_v5, %v2380_v17 }
 0x55b   : > { %2495 = vst [vmem:[%s3823_s27 + $0x38] sm:$0xff] %v2389_v22 }
 0x55c   : > { %2493 = vst [vmem:[%s3823_s27 + $0x28] sm:$0xff] %v2381_v37 }
 0x566   : > { %v3009_v23 = vpop.f32.mrb[132].mxu1 }
 0x567   : > { %v2402_v24 = vadd.f32 %v3009_v23, %v3816_v5  ;;  %v2393_v38 = vpop.f32.mrb[133].mxu1 }
 0x568   : > { %v2394_v26 = vadd.f32 %v3816_v5, %v2393_v38  ;;  %v3010_v27 = vpop.f32.mrb[134].mxu1 }
 0x569   : > { %2498 = vst [vmem:[%s3823_s27 + $0x50] sm:$0xff] %v2402_v24  ;;  %v2405_v28 = vadd.f32 %v3010_v27, %v3816_v5  ;;  %v2396_v29 = vpop.f32.mrb[135].mxu1 }
 0x56a   : > { %2496 = vst [vmem:[%s3823_s27 + $0x40] sm:$0xff] %v2394_v26  ;;  %v2397_v30 = vadd.f32 %v3816_v5, %v2396_v29 }
 0x56b   : > { %2499 = vst [vmem:[%s3823_s27 + $0x58] sm:$0xff] %v2405_v28 }
 0x56c   : > { %2497 = vst [vmem:[%s3823_s27 + $0x48] sm:$0xff] %v2397_v30 }
 0x576   : > { %v3013_v31 = vpop.f32.mrb[136].mxu1 }
 0x577   : > { %v2418_v32 = vadd.f32 %v3013_v31, %v3816_v5  ;;  %v2409_v33 = vpop.f32.mrb[137].mxu1 }
 0x578   : > { %v2410_v34 = vadd.f32 %v3816_v5, %v2409_v33  ;;  %v3014_v35 = vpop.f32.mrb[138].mxu1 }
 0x579   : > { %2502 = vst [vmem:[%s3823_s27 + $0x70] sm:$0xff] %v2418_v32  ;;  %v2421_v36 = vadd.f32 %v3014_v35, %v3816_v5  ;;  %v2412_v39 = vpop.f32.mrb[139].mxu1 }
 0x57a   : > { %2500 = vst [vmem:[%s3823_s27 + $0x60] sm:$0xff] %v2410_v34  ;;  %v2413_v2 = vadd.f32 %v3816_v5, %v2412_v39 }
 0x57b   : > { %2503 = vst [vmem:[%s3823_s27 + $0x78] sm:$0xff] %v2421_v36 }
 0x57c   : > { %2501 = vst [vmem:[%s3823_s27 + $0x68] sm:$0xff] %v2413_v2 }
 0x586   : > { %v3017_v25 = vpop.f32.mrb[140].mxu1 }
 0x587   : > { %v2434_v40 = vadd.f32 %v3017_v25, %v3816_v5  ;;  %v2425_v41 = vpop.f32.mrb[141].mxu1 }
 0x588   : > { %v2426_v42 = vadd.f32 %v3816_v5, %v2425_v41  ;;  %v3018_v43 = vpop.f32.mrb[142].mxu1 }
 0x589   : > { %2506 = vst [vmem:[%s3823_s27 + $0x90] sm:$0xff] %v2434_v40  ;;  %v2437_v44 = vadd.f32 %v3018_v43, %v3816_v5  ;;  %v2428_v11 = vpop.f32.mrb[143].mxu1 }
 0x58a   : > { %2504 = vst [vmem:[%s3823_s27 + $0x80] sm:$0xff] %v2426_v42  ;;  %v2429_v45 = vadd.f32 %v3816_v5, %v2428_v11 }
 0x58b   : > { %2507 = vst [vmem:[%s3823_s27 + $0x98] sm:$0xff] %v2437_v44 }
 0x58c   : > { %2505 = vst [vmem:[%s3823_s27 + $0x88] sm:$0xff] %v2429_v45 }
 0x596   : > { %v3021_v10 = vpop.f32.mrb[144].mxu1 }
 0x597   : > { %v2450_v13 = vadd.f32 %v3021_v10, %v3816_v5  ;;  %v2441_v46 = vpop.f32.mrb[145].mxu1 }
 0x598   : > { %v2442_v47 = vadd.f32 %v3816_v5, %v2441_v46  ;;  %v3022_v48 = vpop.f32.mrb[146].mxu1 }
 0x599   : > { %2510 = vst [vmem:[%s3823_s27 + $0xb0] sm:$0xff] %v2450_v13  ;;  %v2453_v49 = vadd.f32 %v3022_v48, %v3816_v5  ;;  %v2444_v50 = vpop.f32.mrb[147].mxu1 }
 0x59a   : > { %2508 = vst [vmem:[%s3823_s27 + $0xa0] sm:$0xff] %v2442_v47  ;;  %v2445_v51 = vadd.f32 %v3816_v5, %v2444_v50 }
 0x59b   : > { %2511 = vst [vmem:[%s3823_s27 + $0xb8] sm:$0xff] %v2453_v49 }
 0x59c   : > { %2509 = vst [vmem:[%s3823_s27 + $0xa8] sm:$0xff] %v2445_v51 }
 0x5a6   : > { %v3025_v52 = vpop.f32.mrb[148].mxu1 }
 0x5a7   : > { %v2466_v53 = vadd.f32 %v3025_v52, %v3816_v5  ;;  %v2457_v54 = vpop.f32.mrb[149].mxu1 }
 0x5a8   : > { %v2458_v55 = vadd.f32 %v3816_v5, %v2457_v54  ;;  %v3026_v56 = vpop.f32.mrb[150].mxu1 }
 0x5a9   : > { %2514 = vst [vmem:[%s3823_s27 + $0xd0] sm:$0xff] %v2466_v53  ;;  %v2469_v57 = vadd.f32 %v3026_v56, %v3816_v5  ;;  %v2460_v58 = vpop.f32.mrb[151].mxu1 }
 0x5aa   : > { %2512 = vst [vmem:[%s3823_s27 + $0xc0] sm:$0xff] %v2458_v55  ;;  %v2461_v59 = vadd.f32 %v3816_v5, %v2460_v58 }
 0x5ab   : > { %2515 = vst [vmem:[%s3823_s27 + $0xd8] sm:$0xff] %v2469_v57 }
 0x5ac   : > { %2513 = vst [vmem:[%s3823_s27 + $0xc8] sm:$0xff] %v2461_v59 }
 0x5b6   : > { %v3029_v60 = vpop.f32.mrb[152].mxu1 }
 0x5b7   : > { %v2482_v61 = vadd.f32 %v3029_v60, %v3816_v5  ;;  %v2473_v62 = vpop.f32.mrb[153].mxu1 }
 0x5b8   : > { %v2474_v63 = vadd.f32 %v3816_v5, %v2473_v62  ;;  %v3030_v0 = vpop.f32.mrb[154].mxu1 }
 0x5b9   : > { %2518 = vst [vmem:[%s3823_s27 + $0xf0] sm:$0xff] %v2482_v61  ;;  %v2485_v1 = vadd.f32 %v3030_v0, %v3816_v5  ;;  %v2476_v4 = vpop.f32.mrb[155].mxu1 }
 0x5ba   : > { %2516 = vst [vmem:[%s3823_s27 + $0xe0] sm:$0xff] %v2474_v63  ;;  %v2477_v16 = vadd.f32 %v3816_v5, %v2476_v4 }
 0x5bb   : > { %2519 = vst [vmem:[%s3823_s27 + $0xf8] sm:$0xff] %v2485_v1 }
 0x5bc   : > { %2517 = vst [vmem:[%s3823_s27 + $0xe8] sm:$0xff] %v2477_v16 }
 0x5bd PF: > { %s23_s25 = sadd.s32 1, %s3152_s25  }
 0x5be   : > { %p20_p4 = scmp.ge.s32.totalorder %s23_s25, 6  }
 0x5c0   :  { %22 = sbr.rel (!%p20_p4) target bundleno = 1 (0x1), region = 102 }

</bundles_post_ra>
